<compile_context>
chip_gen: v7x
topology: tpu7x:2x2x1
jax: 0.10.0
libtpu: 0.0.40
codegen_flags: <defaults>
</compile_context>

<pallas_src>
import functools

import jax
import jax.numpy as jnp
from jax import lax
from jax.experimental import pallas as pl
from jax.experimental.pallas import tpu as pltpu

LANE = 128     # lane width (last-dim tiling)
SUBLANE = 8    # f32 sublane count (second-to-last dim tiling)


def _round_up(x, m):
    return (x + m - 1) // m * m


# ----------------------------- Pallas kernel --------------------------------

def _lstm_layer_kernel(x_ref, wih_ref, whh_ref, b_ref, y_ref, cout_ref,
                       h_sc, c_sc, pre_sc, *, tc, bc, hp, seq_len, need_mask):
    """One LSTM layer: fused input projection + serial recurrence.

    Grid: (batch_chunks ["parallel"], time_chunks ["arbitrary"/sequential]).
      x_ref   : (tc*bc, Ep)   merged (time-major within chunk) input rows
      wih_ref : (Ep, 4*hp)    input weights (resident)
      whh_ref : (hp, 4*hp)    recurrent weights (resident)
      b_ref   : (1, 4*hp)     bias (resident)
      y_ref   : (tc*bc, hp)   hidden outputs for this chunk (lane-dense)
      cout_ref: (bc, hp)      final cell state for this batch chunk (resident)
      h_sc/c_sc: (bc, hp)     f32 carries in VMEM scratch
      pre_sc  : (tc*bc, 4*hp) f32 pre-gates for this chunk
    """
    t_chunk = pl.program_id(1)

    @pl.when(t_chunk == 0)
    def _init():
        h_sc[...] = jnp.zeros_like(h_sc)
        c_sc[...] = jnp.zeros_like(c_sc)

    # Chunked input projection on the MXU (off the serial critical path):
    # one (tc*bc, Ep) x (Ep, 4Hp) GEMM per grid step.
    pre_sc[...] = (jnp.dot(x_ref[...], wih_ref[...],
                           preferred_element_type=jnp.float32)
                   + b_ref[...])

    def step(i, carry):
        # Only the serial work stays in the loop: one small (bc,hp)x(hp,4hp) matmul.
        row = pl.multiple_of(i * bc, bc)
        gates = pre_sc[pl.ds(row, bc), :] + jnp.dot(
            h_sc[...], whh_ref[...], preferred_element_type=jnp.float32)
        # Gate slices are 128-lane aligned (hp is a multiple of 128) -> free slicing.
        i_g = jax.nn.sigmoid(gates[:, 0 * hp:1 * hp])
        f_g = jax.nn.sigmoid(gates[:, 1 * hp:2 * hp])
        g_g = jnp.tanh(gates[:, 2 * hp:3 * hp])
        o_g = jax.nn.sigmoid(gates[:, 3 * hp:4 * hp])
        c_new = f_g * c_sc[...] + i_g * g_g
        h_new = o_g * jnp.tanh(c_new)
        if need_mask:  # only emitted when T was padded up to a multiple of tc
            valid = (t_chunk * tc + i) < seq_len
            h_new = jnp.where(valid, h_new, h_sc[...])
            c_new = jnp.where(valid, c_new, c_sc[...])
        h_sc[...] = h_new
        c_sc[...] = c_new
        y_ref[pl.ds(row, bc), :] = h_new.astype(y_ref.dtype)
        return carry

    lax.fori_loop(0, tc, step, 0, unroll=True)

    # Resident accumulator output: write once, flushed when the batch block changes.
    @pl.when(t_chunk == pl.num_programs(1) - 1)
    def _fin():
        cout_ref[...] = c_sc[...].astype(cout_ref.dtype)


def lstm_layer(x_m, wih_t, whh_t, bias, *, seq_len, tc, bc):
    """x_m: (n_b*Tp*bc, Ep) f32 merged rows; weights gate-padded & transposed.
       Returns y_m (n_b*Tp*bc, Hp), c_pad (n_b*bc, Hp)."""
    rows_total, Ep = x_m.shape
    G = wih_t.shape[1]
    Hp = G // 4
    chunk_rows = tc * bc

    # rows_total = n_b * Tp * bc
    n_t_total = rows_total // chunk_rows          # = n_b * n_t
    # recover n_b from cout sizing: caller guarantees layout; derive n_t per chunk.
    # (n_b passed implicitly through bc and the caller's padding.)
    # We need n_b and n_t separately for the grid:
    #   rows_total = n_b * Tp * bc,  Tp = n_t * tc
    # caller supplies consistent shapes, so:
    #   n_b = rows_total // (Tp*bc) -- recomputed by caller; here via closure args.
    raise_if = None  # placeholder to keep function body linear
    del raise_if, n_t_total
    return None  # overwritten below (real implementation in _lstm_layer_call)


def _lstm_layer_call(x_m, wih_t, whh_t, bias, *, n_b, n_t, seq_len, tc, bc,
                     tp):
    rows_total, Ep = x_m.shape
    G = wih_t.shape[1]
    Hp = G // 4
    Bp = n_b * bc

    kernel = functools.partial(_lstm_layer_kernel, tc=tc, bc=bc, hp=Hp,
                               seq_len=seq_len, need_mask=(tp != seq_len))

    grid_spec = pltpu.PrefetchScalarGridSpec(
        num_scalar_prefetch=0,
        grid=(n_b, n_t),
        in_specs=[
            pl.BlockSpec((tc * bc, Ep), lambda b, t: (b * n_t + t, 0)),  # x rows
            pl.BlockSpec((Ep, G), lambda b, t: (0, 0)),                  # W_ih^T
            pl.BlockSpec((Hp, G), lambda b, t: (0, 0)),                  # W_hh^T
            pl.BlockSpec((1, G), lambda b, t: (0, 0)),                   # bias
        ],
        out_specs=[
            pl.BlockSpec((tc * bc, Hp), lambda b, t: (b * n_t + t, 0)),  # y rows
            pl.BlockSpec((bc, Hp), lambda b, t: (b, 0)),                 # final cell
        ],
        scratch_shapes=[
            pltpu.VMEM((bc, Hp), jnp.float32),        # h carry
            pltpu.VMEM((bc, Hp), jnp.float32),        # c carry
            pltpu.VMEM((tc * bc, G), jnp.float32),    # chunk pre-gates
        ],
    )

    return pl.pallas_call(
        kernel,
        out_shape=(
            jax.ShapeDtypeStruct((rows_total, Hp), jnp.float32),
            jax.ShapeDtypeStruct((Bp, Hp), jnp.float32),
        ),
        grid_spec=grid_spec,
        compiler_params=pltpu.CompilerParams(
            dimension_semantics=("parallel", "arbitrary"),  # batch ||, time sequential
            vmem_limit_bytes=64 * 1024 * 1024,
        ),
    )(x_m, wih_t, whh_t, bias)


# ----------------------------- Encoder wrapper ------------------------------

def _pad_gate_cols(w, h, hp):
    """(rows, 4h) -> (rows, 4hp): each PyTorch gate block placed at 128-aligned k*hp."""
    rows = w.shape[0]
    out = jnp.zeros((rows, 4 * hp), jnp.float32)
    for k in range(4):
        out = out.at[:, k * hp:k * hp + h].set(w[:, k * h:(k + 1) * h])
    return out


def init_encoder_params(key, vocab_size, embed_size, hidden_size, num_layers):
    keys = jax.random.split(key, 1 + 4 * num_layers)
    params = {"embedding": jax.random.normal(
        keys[0], (vocab_size, embed_size), jnp.float32)}
    k = 1.0 / jnp.sqrt(hidden_size)
    layers = []
    for l in range(num_layers):
        in_dim = embed_size if l == 0 else hidden_size
        kw = keys[1 + 4 * l: 1 + 4 * (l + 1)]
        layers.append({
            "w_ih": jax.random.uniform(kw[0], (4 * hidden_size, in_dim),
                                       jnp.float32, -k, k),
            "w_hh": jax.random.uniform(kw[1], (4 * hidden_size, hidden_size),
                                       jnp.float32, -k, k),
            "b_ih": jax.random.uniform(kw[2], (4 * hidden_size,),
                                       jnp.float32, -k, k),
            "b_hh": jax.random.uniform(kw[3], (4 * hidden_size,),
                                       jnp.float32, -k, k),
        })
    params["lstm"] = layers
    return params


def encoder_forward(tokens, params, *, time_chunk=16):
    """tokens: (B, T) int32.  Returns (hidden, cell): each (num_layers, B, H)."""
    layers = params["lstm"]
    H = layers[0]["w_hh"].shape[1]
    E = params["embedding"].shape[1]
    Hp = _round_up(H, LANE)                     # lane-aligned hidden width
    Ep0 = _round_up(E, LANE)                    # lane-aligned embed width
    B, T = tokens.shape
    bc = min(_round_up(B, SUBLANE), 64)         # per-core batch chunk (multiple of 8)
    Bp = _round_up(B, bc)
    n_b = Bp // bc
    tc = max(1, min(time_chunk, T))             # timesteps per grid step
    Tp = _round_up(T, tc)
    n_t = Tp // tc

    # Embedding gather + relayout: plain JAX glue.
    # TODO(synk): embedding lookup (gather) stays in XLA; no Pallas equivalent needed.
    emb = jnp.take(params["embedding"], tokens, axis=0).astype(jnp.float32)  # (B,T,E)
    emb = jnp.pad(emb, ((0, Bp - B), (0, Tp - T), (0, Ep0 - E)))             # (Bp,Tp,Ep0)
    # Merged row layout: row = ((b_chunk*Tp + t)*bc + j)  -> 2-D lane-dense blocks.
    x = emb.reshape(n_b, bc, Tp, Ep0).transpose(0, 2, 1, 3).reshape(
        n_b * Tp * bc, Ep0)

    hs, cs = [], []
    for li, layer in enumerate(layers):
        in_dim = E if li == 0 else H
        in_pad = x.shape[-1]
        wih_t = _pad_gate_cols(jnp.transpose(layer["w_ih"]).astype(jnp.float32),
                               H, Hp)                               # (in_dim, 4Hp)
        wih_t = jnp.pad(wih_t, ((0, in_pad - in_dim), (0, 0)))      # (Ep, 4Hp)
        whh_t = _pad_gate_cols(jnp.transpose(layer["w_hh"]).astype(jnp.float32),
                               H, Hp)                               # (H, 4Hp)
        whh_t = jnp.pad(whh_t, ((0, Hp - H), (0, 0)))               # (Hp, 4Hp)
        bias = _pad_gate_cols(
            (layer["b_ih"] + layer["b_hh"]).astype(jnp.float32).reshape(1, -1),
            H, Hp)                                                  # (1, 4Hp)

        y_m, c_pad = _lstm_layer_call(x, wih_t, whh_t, bias,
                                      n_b=n_b, n_t=n_t, seq_len=T,
                                      tc=tc, bc=bc, tp=Tp)

        h_last = y_m.reshape(n_b, Tp, bc, Hp)[:, T - 1].reshape(Bp, Hp)
        hs.append(h_last[:B, :H])
        cs.append(c_pad[:B, :H])
        x = y_m                                 # same merged layout for next layer
    return jnp.stack(hs, 0), jnp.stack(cs, 0)


# ----------------------------- pure-JAX reference ---------------------------

def encoder_reference(tokens, params):
    emb = jnp.take(params["embedding"], tokens, axis=0)            # (B, T, E)
    B, T, _ = emb.shape
    H = params["lstm"][0]["w_hh"].shape[1]
    inp = jnp.transpose(emb, (1, 0, 2)).astype(jnp.float32)        # (T, B, E)
    hs, cs = [], []
    for layer in params["lstm"]:
        w_ih, w_hh = layer["w_ih"], layer["w_hh"]
        b = layer["b_ih"] + layer["b_hh"]

        def step(carry, x_t, w_ih=w_ih, w_hh=w_hh, b=b):
            h, c = carry
            gates = (jnp.dot(x_t, w_ih.T, precision=lax.Precision.HIGHEST)
                     + jnp.dot(h, w_hh.T, precision=lax.Precision.HIGHEST) + b)
            i = jax.nn.sigmoid(gates[:, 0:H])
            f = jax.nn.sigmoid(gates[:, H:2 * H])
            g = jnp.tanh(gates[:, 2 * H:3 * H])
            o = jax.nn.sigmoid(gates[:, 3 * H:4 * H])
            c = f * c + i * g
            h = o * jnp.tanh(c)
            return (h, c), h

        (h, c), y = lax.scan(step, (jnp.zeros((B, H)), jnp.zeros((B, H))), inp)
        hs.append(h)
        cs.append(c)
        inp = y
    return jnp.stack(hs, 0), jnp.stack(cs, 0)


# ----------------------------------- main ------------------------------------

if __name__ == "__main__":
    vocab_size, embed_size, hidden_size, num_layers = 20, 16, 32, 2
    batch, seq = 2, 8

    key = jax.random.PRNGKey(0)
    k_tok, k_par = jax.random.split(key)
    tokens = jax.random.randint(k_tok, (batch, seq), 0, vocab_size, jnp.int32)
    params = init_encoder_params(k_par, vocab_size, embed_size,
                                 hidden_size, num_layers)

    hidden, cell = jax.jit(encoder_forward)(tokens, params)
    hidden = jax.block_until_ready(hidden)
    cell = jax.block_until_ready(cell)

    h_ref, c_ref = encoder_reference(tokens, params)
    assert hidden.shape == (num_layers, batch, hidden_size)
    assert cell.shape == (num_layers, batch, hidden_size)
    assert jnp.allclose(hidden, h_ref, atol=1e-4, rtol=1e-4)
    assert jnp.allclose(cell, c_ref, atol=1e-4, rtol=1e-4)

    print("KERNEL_OK")
</pallas_src>

<mosaic_0001>
module attributes {stable_mosaic.version = 11 : i64} {
  func.func @_lstm_layer_kernel(%arg0: i32, %arg1: i32, %arg2: memref<64x128xf32, #tpu.memory_space<vmem>>, %arg3: memref<128x512xf32, #tpu.memory_space<vmem>>, %arg4: memref<128x512xf32, #tpu.memory_space<vmem>>, %arg5: memref<1x512xf32, #tpu.memory_space<vmem>>, %arg6: memref<64x128xf32, #tpu.memory_space<vmem>>, %arg7: memref<8x128xf32, #tpu.memory_space<vmem>>, %arg8: memref<8x128xf32, #tpu.memory_space<vmem>>, %arg9: memref<8x128xf32, #tpu.memory_space<vmem>>, %arg10: memref<64x512xf32, #tpu.memory_space<vmem>>) attributes {dimension_semantics = [#tpu.dimension_semantics<parallel>, #tpu.dimension_semantics<arbitrary>], iteration_bounds = array<i64: 1, 1>, scalar_prefetch = 0 : i64, scratch_operands = 3 : i64, tpu.core_type = #tpu.core_type<tc>, window_params = [{transform_indices = @transform_0, window_bounds = array<i64: 64, 128>}, {pipeline_mode = #tpu.pipeline_mode<synchronous>, transform_indices = @transform_1, window_bounds = array<i64: 128, 512>}, {pipeline_mode = #tpu.pipeline_mode<synchronous>, transform_indices = @transform_2, window_bounds = array<i64: 128, 512>}, {pipeline_mode = #tpu.pipeline_mode<synchronous>, transform_indices = @transform_3, window_bounds = array<i64: 1, 512>}, {transform_indices = @transform_4, window_bounds = array<i64: 64, 128>}, {transform_indices = @transform_5, window_bounds = array<i64: 8, 128>}]} {
    %c0_i32 = arith.constant 0 : i32
    %0 = arith.cmpi eq, %arg1, %c0_i32 : i32
    %1 = arith.extui %0 : i1 to i32
    %c0_i32_0 = arith.constant 0 : i32
    %2 = arith.cmpi ne, %1, %c0_i32_0 : i32
    scf.if %2 {
      %cst_147 = arith.constant 0.000000e+00 : f32
      %317 = vector.broadcast %cst_147 : f32 to vector<8x128xf32>
      %c0_148 = arith.constant 0 : index
      %c0_149 = arith.constant 0 : index
      %318 = vector.load %arg8[%c0_148, %c0_149] : memref<8x128xf32, #tpu.memory_space<vmem>>, vector<8x128xf32>
      tpu.vector_store %arg8[%c0_148, %c0_149], %317 {strides = array<i32>} : memref<8x128xf32, #tpu.memory_space<vmem>>, vector<8x128xf32>,
      %cst_150 = arith.constant 0.000000e+00 : f32
      %319 = vector.broadcast %cst_150 : f32 to vector<8x128xf32>
      %c0_151 = arith.constant 0 : index
      %c0_152 = arith.constant 0 : index
      %320 = vector.load %arg9[%c0_151, %c0_152] : memref<8x128xf32, #tpu.memory_space<vmem>>, vector<8x128xf32>
      tpu.vector_store %arg9[%c0_151, %c0_152], %319 {strides = array<i32>} : memref<8x128xf32, #tpu.memory_space<vmem>>, vector<8x128xf32>,
    } else {
    }
    %c0 = arith.constant 0 : index
    %c0_1 = arith.constant 0 : index
    %3 = vector.load %arg2[%c0, %c0_1] : memref<64x128xf32, #tpu.memory_space<vmem>>, vector<64x128xf32>
    %c0_2 = arith.constant 0 : index
    %c0_3 = arith.constant 0 : index
    %4 = vector.load %arg3[%c0_2, %c0_3] : memref<128x512xf32, #tpu.memory_space<vmem>>, vector<128x512xf32>
    %cst = arith.constant dense<0.000000e+00> : vector<64x512xf32>
    %5 = tpu.matmul %3, %4, %cst {dimension_numbers = #tpu.dot_dimension_numbers<[1], [0], [0], [1], [0, 0, 1, 1], [], []>} : vector<64x128xf32>, vector<128x512xf32>, vector<64x512xf32> -> vector<64x512xf32>
    %c0_4 = arith.constant 0 : index
    %c0_5 = arith.constant 0 : index
    %6 = vector.load %arg5[%c0_4, %c0_5] : memref<1x512xf32, #tpu.memory_space<vmem>>, vector<1x512xf32>
    %7 = vector.broadcast %6 : vector<1x512xf32> to vector<64x512xf32>
    %8 = arith.addf %5, %7 : vector<64x512xf32>
    %c0_6 = arith.constant 0 : index
    %c0_7 = arith.constant 0 : index
    %9 = vector.load %arg10[%c0_6, %c0_7] : memref<64x512xf32, #tpu.memory_space<vmem>>, vector<64x512xf32>
    tpu.vector_store %arg10[%c0_6, %c0_7], %8 {strides = array<i32>} : memref<64x512xf32, #tpu.memory_space<vmem>>, vector<64x512xf32>,
    %c0_i32_8 = arith.constant 0 : i32
    %c8_i32 = arith.constant 8 : i32
    %10 = arith.muli %c0_i32_8, %c8_i32 : i32
    %11 = tpu.assume_multiple %10, 8 : i32
    %12 = arith.index_cast %11 : i32 to index
    %c0_9 = arith.constant 0 : index
    %13 = vector.load %arg10[%12, %c0_9] : memref<64x512xf32, #tpu.memory_space<vmem>>, vector<8x512xf32>
    %c0_10 = arith.constant 0 : index
    %c0_11 = arith.constant 0 : index
    %14 = vector.load %arg8[%c0_10, %c0_11] : memref<8x128xf32, #tpu.memory_space<vmem>>, vector<8x128xf32>
    %c0_12 = arith.constant 0 : index
    %c0_13 = arith.constant 0 : index
    %15 = vector.load %arg4[%c0_12, %c0_13] : memref<128x512xf32, #tpu.memory_space<vmem>>, vector<128x512xf32>
    %cst_14 = arith.constant dense<0.000000e+00> : vector<8x512xf32>
    %16 = tpu.matmul %14, %15, %cst_14 {dimension_numbers = #tpu.dot_dimension_numbers<[1], [0], [0], [1], [0, 0, 1, 1], [], []>} : vector<8x128xf32>, vector<128x512xf32>, vector<8x512xf32> -> vector<8x512xf32>
    %17 = arith.addf %13, %16 : vector<8x512xf32>
    %18 = vector.extract_strided_slice %17 {offsets = [0, 0], sizes = [8, 128], strides = [1, 1]} : vector<8x512xf32> to vector<8x128xf32>
    %19 = arith.negf %18 : vector<8x128xf32>
    %20 = math.exp %19 : vector<8x128xf32>
    %cst_15 = arith.constant 1.000000e+00 : f32
    %21 = vector.broadcast %cst_15 : f32 to vector<8x128xf32>
    %22 = arith.addf %21, %20 : vector<8x128xf32>
    %23 = arith.divf %21, %22 : vector<8x128xf32>
    %24 = vector.extract_strided_slice %17 {offsets = [0, 128], sizes = [8, 128], strides = [1, 1]} : vector<8x512xf32> to vector<8x128xf32>
    %25 = arith.negf %24 : vector<8x128xf32>
    %26 = math.exp %25 : vector<8x128xf32>
    %cst_16 = arith.constant 1.000000e+00 : f32
    %27 = vector.broadcast %cst_16 : f32 to vector<8x128xf32>
    %28 = arith.addf %27, %26 : vector<8x128xf32>
    %29 = arith.divf %27, %28 : vector<8x128xf32>
    %30 = vector.extract_strided_slice %17 {offsets = [0, 256], sizes = [8, 128], strides = [1, 1]} : vector<8x512xf32> to vector<8x128xf32>
    %31 = math.tanh %30 : vector<8x128xf32>
    %32 = vector.extract_strided_slice %17 {offsets = [0, 384], sizes = [8, 128], strides = [1, 1]} : vector<8x512xf32> to vector<8x128xf32>
    %33 = arith.negf %32 : vector<8x128xf32>
    %34 = math.exp %33 : vector<8x128xf32>
    %cst_17 = arith.constant 1.000000e+00 : f32
    %35 = vector.broadcast %cst_17 : f32 to vector<8x128xf32>
    %36 = arith.addf %35, %34 : vector<8x128xf32>
    %37 = arith.divf %35, %36 : vector<8x128xf32>
    %c0_18 = arith.constant 0 : index
    %c0_19 = arith.constant 0 : index
    %38 = vector.load %arg9[%c0_18, %c0_19] : memref<8x128xf32, #tpu.memory_space<vmem>>, vector<8x128xf32>
    %39 = arith.mulf %29, %38 : vector<8x128xf32>
    %40 = arith.mulf %23, %31 : vector<8x128xf32>
    %41 = arith.addf %39, %40 : vector<8x128xf32>
    %42 = math.tanh %41 : vector<8x128xf32>
    %43 = arith.mulf %37, %42 : vector<8x128xf32>
    %c0_20 = arith.constant 0 : index
    %c0_21 = arith.constant 0 : index
    %44 = vector.load %arg8[%c0_20, %c0_21] : memref<8x128xf32, #tpu.memory_space<vmem>>, vector<8x128xf32>
    tpu.vector_store %arg8[%c0_20, %c0_21], %43 {strides = array<i32>} : memref<8x128xf32, #tpu.memory_space<vmem>>, vector<8x128xf32>,
    %c0_22 = arith.constant 0 : index
    %c0_23 = arith.constant 0 : index
    %45 = vector.load %arg9[%c0_22, %c0_23] : memref<8x128xf32, #tpu.memory_space<vmem>>, vector<8x128xf32>
    tpu.vector_store %arg9[%c0_22, %c0_23], %41 {strides = array<i32>} : memref<8x128xf32, #tpu.memory_space<vmem>>, vector<8x128xf32>,
    %46 = arith.index_cast %11 : i32 to index
    %c0_24 = arith.constant 0 : index
    %47 = vector.load %arg6[%46, %c0_24] : memref<64x128xf32, #tpu.memory_space<vmem>>, vector<8x128xf32>
    tpu.vector_store %arg6[%46, %c0_24], %43 {strides = array<i32>} : memref<64x128xf32, #tpu.memory_space<vmem>>, vector<8x128xf32>,
    %c1_i32 = arith.constant 1 : i32
    %c8_i32_25 = arith.constant 8 : i32
    %48 = arith.muli %c1_i32, %c8_i32_25 : i32
    %49 = tpu.assume_multiple %48, 8 : i32
    %50 = arith.index_cast %49 : i32 to index
    %c0_26 = arith.constant 0 : index
    %51 = vector.load %arg10[%50, %c0_26] : memref<64x512xf32, #tpu.memory_space<vmem>>, vector<8x512xf32>
    %c0_27 = arith.constant 0 : index
    %c0_28 = arith.constant 0 : index
    %52 = vector.load %arg8[%c0_27, %c0_28] : memref<8x128xf32, #tpu.memory_space<vmem>>, vector<8x128xf32>
    %c0_29 = arith.constant 0 : index
    %c0_30 = arith.constant 0 : index
    %53 = vector.load %arg4[%c0_29, %c0_30] : memref<128x512xf32, #tpu.memory_space<vmem>>, vector<128x512xf32>
    %cst_31 = arith.constant dense<0.000000e+00> : vector<8x512xf32>
    %54 = tpu.matmul %52, %53, %cst_31 {dimension_numbers = #tpu.dot_dimension_numbers<[1], [0], [0], [1], [0, 0, 1, 1], [], []>} : vector<8x128xf32>, vector<128x512xf32>, vector<8x512xf32> -> vector<8x512xf32>
    %55 = arith.addf %51, %54 : vector<8x512xf32>
    %56 = vector.extract_strided_slice %55 {offsets = [0, 0], sizes = [8, 128], strides = [1, 1]} : vector<8x512xf32> to vector<8x128xf32>
    %57 = arith.negf %56 : vector<8x128xf32>
    %58 = math.exp %57 : vector<8x128xf32>
    %cst_32 = arith.constant 1.000000e+00 : f32
    %59 = vector.broadcast %cst_32 : f32 to vector<8x128xf32>
    %60 = arith.addf %59, %58 : vector<8x128xf32>
    %61 = arith.divf %59, %60 : vector<8x128xf32>
    %62 = vector.extract_strided_slice %55 {offsets = [0, 128], sizes = [8, 128], strides = [1, 1]} : vector<8x512xf32> to vector<8x128xf32>
    %63 = arith.negf %62 : vector<8x128xf32>
    %64 = math.exp %63 : vector<8x128xf32>
    %cst_33 = arith.constant 1.000000e+00 : f32
    %65 = vector.broadcast %cst_33 : f32 to vector<8x128xf32>
    %66 = arith.addf %65, %64 : vector<8x128xf32>
    %67 = arith.divf %65, %66 : vector<8x128xf32>
    %68 = vector.extract_strided_slice %55 {offsets = [0, 256], sizes = [8, 128], strides = [1, 1]} : vector<8x512xf32> to vector<8x128xf32>
    %69 = math.tanh %68 : vector<8x128xf32>
    %70 = vector.extract_strided_slice %55 {offsets = [0, 384], sizes = [8, 128], strides = [1, 1]} : vector<8x512xf32> to vector<8x128xf32>
    %71 = arith.negf %70 : vector<8x128xf32>
    %72 = math.exp %71 : vector<8x128xf32>
    %cst_34 = arith.constant 1.000000e+00 : f32
    %73 = vector.broadcast %cst_34 : f32 to vector<8x128xf32>
    %74 = arith.addf %73, %72 : vector<8x128xf32>
    %75 = arith.divf %73, %74 : vector<8x128xf32>
    %c0_35 = arith.constant 0 : index
    %c0_36 = arith.constant 0 : index
    %76 = vector.load %arg9[%c0_35, %c0_36] : memref<8x128xf32, #tpu.memory_space<vmem>>, vector<8x128xf32>
    %77 = arith.mulf %67, %76 : vector<8x128xf32>
    %78 = arith.mulf %61, %69 : vector<8x128xf32>
    %79 = arith.addf %77, %78 : vector<8x128xf32>
    %80 = math.tanh %79 : vector<8x128xf32>
    %81 = arith.mulf %75, %80 : vector<8x128xf32>
    %c0_37 = arith.constant 0 : index
    %c0_38 = arith.constant 0 : index
    %82 = vector.load %arg8[%c0_37, %c0_38] : memref<8x128xf32, #tpu.memory_space<vmem>>, vector<8x128xf32>
    tpu.vector_store %arg8[%c0_37, %c0_38], %81 {strides = array<i32>} : memref<8x128xf32, #tpu.memory_space<vmem>>, vector<8x128xf32>,
    %c0_39 = arith.constant 0 : index
    %c0_40 = arith.constant 0 : index
    %83 = vector.load %arg9[%c0_39, %c0_40] : memref<8x128xf32, #tpu.memory_space<vmem>>, vector<8x128xf32>
    tpu.vector_store %arg9[%c0_39, %c0_40], %79 {strides = array<i32>} : memref<8x128xf32, #tpu.memory_space<vmem>>, vector<8x128xf32>,
    %84 = arith.index_cast %49 : i32 to index
    %c0_41 = arith.constant 0 : index
    %85 = vector.load %arg6[%84, %c0_41] : memref<64x128xf32, #tpu.memory_space<vmem>>, vector<8x128xf32>
    tpu.vector_store %arg6[%84, %c0_41], %81 {strides = array<i32>} : memref<64x128xf32, #tpu.memory_space<vmem>>, vector<8x128xf32>,
    %c2_i32 = arith.constant 2 : i32
    %c8_i32_42 = arith.constant 8 : i32
    %86 = arith.muli %c2_i32, %c8_i32_42 : i32
    %87 = tpu.assume_multiple %86, 8 : i32
    %88 = arith.index_cast %87 : i32 to index
    %c0_43 = arith.constant 0 : index
    %89 = vector.load %arg10[%88, %c0_43] : memref<64x512xf32, #tpu.memory_space<vmem>>, vector<8x512xf32>
    %c0_44 = arith.constant 0 : index
    %c0_45 = arith.constant 0 : index
    %90 = vector.load %arg8[%c0_44, %c0_45] : memref<8x128xf32, #tpu.memory_space<vmem>>, vector<8x128xf32>
    %c0_46 = arith.constant 0 : index
    %c0_47 = arith.constant 0 : index
    %91 = vector.load %arg4[%c0_46, %c0_47] : memref<128x512xf32, #tpu.memory_space<vmem>>, vector<128x512xf32>
    %cst_48 = arith.constant dense<0.000000e+00> : vector<8x512xf32>
    %92 = tpu.matmul %90, %91, %cst_48 {dimension_numbers = #tpu.dot_dimension_numbers<[1], [0], [0], [1], [0, 0, 1, 1], [], []>} : vector<8x128xf32>, vector<128x512xf32>, vector<8x512xf32> -> vector<8x512xf32>
    %93 = arith.addf %89, %92 : vector<8x512xf32>
    %94 = vector.extract_strided_slice %93 {offsets = [0, 0], sizes = [8, 128], strides = [1, 1]} : vector<8x512xf32> to vector<8x128xf32>
    %95 = arith.negf %94 : vector<8x128xf32>
    %96 = math.exp %95 : vector<8x128xf32>
    %cst_49 = arith.constant 1.000000e+00 : f32
    %97 = vector.broadcast %cst_49 : f32 to vector<8x128xf32>
    %98 = arith.addf %97, %96 : vector<8x128xf32>
    %99 = arith.divf %97, %98 : vector<8x128xf32>
    %100 = vector.extract_strided_slice %93 {offsets = [0, 128], sizes = [8, 128], strides = [1, 1]} : vector<8x512xf32> to vector<8x128xf32>
    %101 = arith.negf %100 : vector<8x128xf32>
    %102 = math.exp %101 : vector<8x128xf32>
    %cst_50 = arith.constant 1.000000e+00 : f32
    %103 = vector.broadcast %cst_50 : f32 to vector<8x128xf32>
    %104 = arith.addf %103, %102 : vector<8x128xf32>
    %105 = arith.divf %103, %104 : vector<8x128xf32>
    %106 = vector.extract_strided_slice %93 {offsets = [0, 256], sizes = [8, 128], strides = [1, 1]} : vector<8x512xf32> to vector<8x128xf32>
    %107 = math.tanh %106 : vector<8x128xf32>
    %108 = vector.extract_strided_slice %93 {offsets = [0, 384], sizes = [8, 128], strides = [1, 1]} : vector<8x512xf32> to vector<8x128xf32>
    %109 = arith.negf %108 : vector<8x128xf32>
    %110 = math.exp %109 : vector<8x128xf32>
    %cst_51 = arith.constant 1.000000e+00 : f32
    %111 = vector.broadcast %cst_51 : f32 to vector<8x128xf32>
    %112 = arith.addf %111, %110 : vector<8x128xf32>
    %113 = arith.divf %111, %112 : vector<8x128xf32>
    %c0_52 = arith.constant 0 : index
    %c0_53 = arith.constant 0 : index
    %114 = vector.load %arg9[%c0_52, %c0_53] : memref<8x128xf32, #tpu.memory_space<vmem>>, vector<8x128xf32>
    %115 = arith.mulf %105, %114 : vector<8x128xf32>
    %116 = arith.mulf %99, %107 : vector<8x128xf32>
    %117 = arith.addf %115, %116 : vector<8x128xf32>
    %118 = math.tanh %117 : vector<8x128xf32>
    %119 = arith.mulf %113, %118 : vector<8x128xf32>
    %c0_54 = arith.constant 0 : index
    %c0_55 = arith.constant 0 : index
    %120 = vector.load %arg8[%c0_54, %c0_55] : memref<8x128xf32, #tpu.memory_space<vmem>>, vector<8x128xf32>
    tpu.vector_store %arg8[%c0_54, %c0_55], %119 {strides = array<i32>} : memref<8x128xf32, #tpu.memory_space<vmem>>, vector<8x128xf32>,
    %c0_56 = arith.constant 0 : index
    %c0_57 = arith.constant 0 : index
    %121 = vector.load %arg9[%c0_56, %c0_57] : memref<8x128xf32, #tpu.memory_space<vmem>>, vector<8x128xf32>
    tpu.vector_store %arg9[%c0_56, %c0_57], %117 {strides = array<i32>} : memref<8x128xf32, #tpu.memory_space<vmem>>, vector<8x128xf32>,
    %122 = arith.index_cast %87 : i32 to index
    %c0_58 = arith.constant 0 : index
    %123 = vector.load %arg6[%122, %c0_58] : memref<64x128xf32, #tpu.memory_space<vmem>>, vector<8x128xf32>
    tpu.vector_store %arg6[%122, %c0_58], %119 {strides = array<i32>} : memref<64x128xf32, #tpu.memory_space<vmem>>, vector<8x128xf32>,
    %c3_i32 = arith.constant 3 : i32
    %c8_i32_59 = arith.constant 8 : i32
    %124 = arith.muli %c3_i32, %c8_i32_59 : i32
    %125 = tpu.assume_multiple %124, 8 : i32
    %126 = arith.index_cast %125 : i32 to index
    %c0_60 = arith.constant 0 : index
    %127 = vector.load %arg10[%126, %c0_60] : memref<64x512xf32, #tpu.memory_space<vmem>>, vector<8x512xf32>
    %c0_61 = arith.constant 0 : index
    %c0_62 = arith.constant 0 : index
    %128 = vector.load %arg8[%c0_61, %c0_62] : memref<8x128xf32, #tpu.memory_space<vmem>>, vector<8x128xf32>
    %c0_63 = arith.constant 0 : index
    %c0_64 = arith.constant 0 : index
    %129 = vector.load %arg4[%c0_63, %c0_64] : memref<128x512xf32, #tpu.memory_space<vmem>>, vector<128x512xf32>
    %cst_65 = arith.constant dense<0.000000e+00> : vector<8x512xf32>
    %130 = tpu.matmul %128, %129, %cst_65 {dimension_numbers = #tpu.dot_dimension_numbers<[1], [0], [0], [1], [0, 0, 1, 1], [], []>} : vector<8x128xf32>, vector<128x512xf32>, vector<8x512xf32> -> vector<8x512xf32>
    %131 = arith.addf %127, %130 : vector<8x512xf32>
    %132 = vector.extract_strided_slice %131 {offsets = [0, 0], sizes = [8, 128], strides = [1, 1]} : vector<8x512xf32> to vector<8x128xf32>
    %133 = arith.negf %132 : vector<8x128xf32>
    %134 = math.exp %133 : vector<8x128xf32>
    %cst_66 = arith.constant 1.000000e+00 : f32
    %135 = vector.broadcast %cst_66 : f32 to vector<8x128xf32>
    %136 = arith.addf %135, %134 : vector<8x128xf32>
    %137 = arith.divf %135, %136 : vector<8x128xf32>
    %138 = vector.extract_strided_slice %131 {offsets = [0, 128], sizes = [8, 128], strides = [1, 1]} : vector<8x512xf32> to vector<8x128xf32>
    %139 = arith.negf %138 : vector<8x128xf32>
    %140 = math.exp %139 : vector<8x128xf32>
    %cst_67 = arith.constant 1.000000e+00 : f32
    %141 = vector.broadcast %cst_67 : f32 to vector<8x128xf32>
    %142 = arith.addf %141, %140 : vector<8x128xf32>
    %143 = arith.divf %141, %142 : vector<8x128xf32>
    %144 = vector.extract_strided_slice %131 {offsets = [0, 256], sizes = [8, 128], strides = [1, 1]} : vector<8x512xf32> to vector<8x128xf32>
    %145 = math.tanh %144 : vector<8x128xf32>
    %146 = vector.extract_strided_slice %131 {offsets = [0, 384], sizes = [8, 128], strides = [1, 1]} : vector<8x512xf32> to vector<8x128xf32>
    %147 = arith.negf %146 : vector<8x128xf32>
    %148 = math.exp %147 : vector<8x128xf32>
    %cst_68 = arith.constant 1.000000e+00 : f32
    %149 = vector.broadcast %cst_68 : f32 to vector<8x128xf32>
    %150 = arith.addf %149, %148 : vector<8x128xf32>
    %151 = arith.divf %149, %150 : vector<8x128xf32>
    %c0_69 = arith.constant 0 : index
    %c0_70 = arith.constant 0 : index
    %152 = vector.load %arg9[%c0_69, %c0_70] : memref<8x128xf32, #tpu.memory_space<vmem>>, vector<8x128xf32>
    %153 = arith.mulf %143, %152 : vector<8x128xf32>
    %154 = arith.mulf %137, %145 : vector<8x128xf32>
    %155 = arith.addf %153, %154 : vector<8x128xf32>
    %156 = math.tanh %155 : vector<8x128xf32>
    %157 = arith.mulf %151, %156 : vector<8x128xf32>
    %c0_71 = arith.constant 0 : index
    %c0_72 = arith.constant 0 : index
    %158 = vector.load %arg8[%c0_71, %c0_72] : memref<8x128xf32, #tpu.memory_space<vmem>>, vector<8x128xf32>
    tpu.vector_store %arg8[%c0_71, %c0_72], %157 {strides = array<i32>} : memref<8x128xf32, #tpu.memory_space<vmem>>, vector<8x128xf32>,
    %c0_73 = arith.constant 0 : index
    %c0_74 = arith.constant 0 : index
    %159 = vector.load %arg9[%c0_73, %c0_74] : memref<8x128xf32, #tpu.memory_space<vmem>>, vector<8x128xf32>
    tpu.vector_store %arg9[%c0_73, %c0_74], %155 {strides = array<i32>} : memref<8x128xf32, #tpu.memory_space<vmem>>, vector<8x128xf32>,
    %160 = arith.index_cast %125 : i32 to index
    %c0_75 = arith.constant 0 : index
    %161 = vector.load %arg6[%160, %c0_75] : memref<64x128xf32, #tpu.memory_space<vmem>>, vector<8x128xf32>
    tpu.vector_store %arg6[%160, %c0_75], %157 {strides = array<i32>} : memref<64x128xf32, #tpu.memory_space<vmem>>, vector<8x128xf32>,
    %c4_i32 = arith.constant 4 : i32
    %c8_i32_76 = arith.constant 8 : i32
    %162 = arith.muli %c4_i32, %c8_i32_76 : i32
    %163 = tpu.assume_multiple %162, 8 : i32
    %164 = arith.index_cast %163 : i32 to index
    %c0_77 = arith.constant 0 : index
    %165 = vector.load %arg10[%164, %c0_77] : memref<64x512xf32, #tpu.memory_space<vmem>>, vector<8x512xf32>
    %c0_78 = arith.constant 0 : index
    %c0_79 = arith.constant 0 : index
    %166 = vector.load %arg8[%c0_78, %c0_79] : memref<8x128xf32, #tpu.memory_space<vmem>>, vector<8x128xf32>
    %c0_80 = arith.constant 0 : index
    %c0_81 = arith.constant 0 : index
    %167 = vector.load %arg4[%c0_80, %c0_81] : memref<128x512xf32, #tpu.memory_space<vmem>>, vector<128x512xf32>
    %cst_82 = arith.constant dense<0.000000e+00> : vector<8x512xf32>
    %168 = tpu.matmul %166, %167, %cst_82 {dimension_numbers = #tpu.dot_dimension_numbers<[1], [0], [0], [1], [0, 0, 1, 1], [], []>} : vector<8x128xf32>, vector<128x512xf32>, vector<8x512xf32> -> vector<8x512xf32>
    %169 = arith.addf %165, %168 : vector<8x512xf32>
    %170 = vector.extract_strided_slice %169 {offsets = [0, 0], sizes = [8, 128], strides = [1, 1]} : vector<8x512xf32> to vector<8x128xf32>
    %171 = arith.negf %170 : vector<8x128xf32>
    %172 = math.exp %171 : vector<8x128xf32>
    %cst_83 = arith.constant 1.000000e+00 : f32
    %173 = vector.broadcast %cst_83 : f32 to vector<8x128xf32>
    %174 = arith.addf %173, %172 : vector<8x128xf32>
    %175 = arith.divf %173, %174 : vector<8x128xf32>
    %176 = vector.extract_strided_slice %169 {offsets = [0, 128], sizes = [8, 128], strides = [1, 1]} : vector<8x512xf32> to vector<8x128xf32>
    %177 = arith.negf %176 : vector<8x128xf32>
    %178 = math.exp %177 : vector<8x128xf32>
    %cst_84 = arith.constant 1.000000e+00 : f32
    %179 = vector.broadcast %cst_84 : f32 to vector<8x128xf32>
    %180 = arith.addf %179, %178 : vector<8x128xf32>
    %181 = arith.divf %179, %180 : vector<8x128xf32>
    %182 = vector.extract_strided_slice %169 {offsets = [0, 256], sizes = [8, 128], strides = [1, 1]} : vector<8x512xf32> to vector<8x128xf32>
    %183 = math.tanh %182 : vector<8x128xf32>
    %184 = vector.extract_strided_slice %169 {offsets = [0, 384], sizes = [8, 128], strides = [1, 1]} : vector<8x512xf32> to vector<8x128xf32>
    %185 = arith.negf %184 : vector<8x128xf32>
    %186 = math.exp %185 : vector<8x128xf32>
    %cst_85 = arith.constant 1.000000e+00 : f32
    %187 = vector.broadcast %cst_85 : f32 to vector<8x128xf32>
    %188 = arith.addf %187, %186 : vector<8x128xf32>
    %189 = arith.divf %187, %188 : vector<8x128xf32>
    %c0_86 = arith.constant 0 : index
    %c0_87 = arith.constant 0 : index
    %190 = vector.load %arg9[%c0_86, %c0_87] : memref<8x128xf32, #tpu.memory_space<vmem>>, vector<8x128xf32>
    %191 = arith.mulf %181, %190 : vector<8x128xf32>
    %192 = arith.mulf %175, %183 : vector<8x128xf32>
    %193 = arith.addf %191, %192 : vector<8x128xf32>
    %194 = math.tanh %193 : vector<8x128xf32>
    %195 = arith.mulf %189, %194 : vector<8x128xf32>
    %c0_88 = arith.constant 0 : index
    %c0_89 = arith.constant 0 : index
    %196 = vector.load %arg8[%c0_88, %c0_89] : memref<8x128xf32, #tpu.memory_space<vmem>>, vector<8x128xf32>
    tpu.vector_store %arg8[%c0_88, %c0_89], %195 {strides = array<i32>} : memref<8x128xf32, #tpu.memory_space<vmem>>, vector<8x128xf32>,
    %c0_90 = arith.constant 0 : index
    %c0_91 = arith.constant 0 : index
    %197 = vector.load %arg9[%c0_90, %c0_91] : memref<8x128xf32, #tpu.memory_space<vmem>>, vector<8x128xf32>
    tpu.vector_store %arg9[%c0_90, %c0_91], %193 {strides = array<i32>} : memref<8x128xf32, #tpu.memory_space<vmem>>, vector<8x128xf32>,
    %198 = arith.index_cast %163 : i32 to index
    %c0_92 = arith.constant 0 : index
    %199 = vector.load %arg6[%198, %c0_92] : memref<64x128xf32, #tpu.memory_space<vmem>>, vector<8x128xf32>
    tpu.vector_store %arg6[%198, %c0_92], %195 {strides = array<i32>} : memref<64x128xf32, #tpu.memory_space<vmem>>, vector<8x128xf32>,
    %c5_i32 = arith.constant 5 : i32
    %c8_i32_93 = arith.constant 8 : i32
    %200 = arith.muli %c5_i32, %c8_i32_93 : i32
    %201 = tpu.assume_multiple %200, 8 : i32
    %202 = arith.index_cast %201 : i32 to index
    %c0_94 = arith.constant 0 : index
    %203 = vector.load %arg10[%202, %c0_94] : memref<64x512xf32, #tpu.memory_space<vmem>>, vector<8x512xf32>
    %c0_95 = arith.constant 0 : index
    %c0_96 = arith.constant 0 : index
    %204 = vector.load %arg8[%c0_95, %c0_96] : memref<8x128xf32, #tpu.memory_space<vmem>>, vector<8x128xf32>
    %c0_97 = arith.constant 0 : index
    %c0_98 = arith.constant 0 : index
    %205 = vector.load %arg4[%c0_97, %c0_98] : memref<128x512xf32, #tpu.memory_space<vmem>>, vector<128x512xf32>
    %cst_99 = arith.constant dense<0.000000e+00> : vector<8x512xf32>
    %206 = tpu.matmul %204, %205, %cst_99 {dimension_numbers = #tpu.dot_dimension_numbers<[1], [0], [0], [1], [0, 0, 1, 1], [], []>} : vector<8x128xf32>, vector<128x512xf32>, vector<8x512xf32> -> vector<8x512xf32>
    %207 = arith.addf %203, %206 : vector<8x512xf32>
    %208 = vector.extract_strided_slice %207 {offsets = [0, 0], sizes = [8, 128], strides = [1, 1]} : vector<8x512xf32> to vector<8x128xf32>
    %209 = arith.negf %208 : vector<8x128xf32>
    %210 = math.exp %209 : vector<8x128xf32>
    %cst_100 = arith.constant 1.000000e+00 : f32
    %211 = vector.broadcast %cst_100 : f32 to vector<8x128xf32>
    %212 = arith.addf %211, %210 : vector<8x128xf32>
    %213 = arith.divf %211, %212 : vector<8x128xf32>
    %214 = vector.extract_strided_slice %207 {offsets = [0, 128], sizes = [8, 128], strides = [1, 1]} : vector<8x512xf32> to vector<8x128xf32>
    %215 = arith.negf %214 : vector<8x128xf32>
    %216 = math.exp %215 : vector<8x128xf32>
    %cst_101 = arith.constant 1.000000e+00 : f32
    %217 = vector.broadcast %cst_101 : f32 to vector<8x128xf32>
    %218 = arith.addf %217, %216 : vector<8x128xf32>
    %219 = arith.divf %217, %218 : vector<8x128xf32>
    %220 = vector.extract_strided_slice %207 {offsets = [0, 256], sizes = [8, 128], strides = [1, 1]} : vector<8x512xf32> to vector<8x128xf32>
    %221 = math.tanh %220 : vector<8x128xf32>
    %222 = vector.extract_strided_slice %207 {offsets = [0, 384], sizes = [8, 128], strides = [1, 1]} : vector<8x512xf32> to vector<8x128xf32>
    %223 = arith.negf %222 : vector<8x128xf32>
    %224 = math.exp %223 : vector<8x128xf32>
    %cst_102 = arith.constant 1.000000e+00 : f32
    %225 = vector.broadcast %cst_102 : f32 to vector<8x128xf32>
    %226 = arith.addf %225, %224 : vector<8x128xf32>
    %227 = arith.divf %225, %226 : vector<8x128xf32>
    %c0_103 = arith.constant 0 : index
    %c0_104 = arith.constant 0 : index
    %228 = vector.load %arg9[%c0_103, %c0_104] : memref<8x128xf32, #tpu.memory_space<vmem>>, vector<8x128xf32>
    %229 = arith.mulf %219, %228 : vector<8x128xf32>
    %230 = arith.mulf %213, %221 : vector<8x128xf32>
    %231 = arith.addf %229, %230 : vector<8x128xf32>
    %232 = math.tanh %231 : vector<8x128xf32>
    %233 = arith.mulf %227, %232 : vector<8x128xf32>
    %c0_105 = arith.constant 0 : index
    %c0_106 = arith.constant 0 : index
    %234 = vector.load %arg8[%c0_105, %c0_106] : memref<8x128xf32, #tpu.memory_space<vmem>>, vector<8x128xf32>
    tpu.vector_store %arg8[%c0_105, %c0_106], %233 {strides = array<i32>} : memref<8x128xf32, #tpu.memory_space<vmem>>, vector<8x128xf32>,
    %c0_107 = arith.constant 0 : index
    %c0_108 = arith.constant 0 : index
    %235 = vector.load %arg9[%c0_107, %c0_108] : memref<8x128xf32, #tpu.memory_space<vmem>>, vector<8x128xf32>
    tpu.vector_store %arg9[%c0_107, %c0_108], %231 {strides = array<i32>} : memref<8x128xf32, #tpu.memory_space<vmem>>, vector<8x128xf32>,
    %236 = arith.index_cast %201 : i32 to index
    %c0_109 = arith.constant 0 : index
    %237 = vector.load %arg6[%236, %c0_109] : memref<64x128xf32, #tpu.memory_space<vmem>>, vector<8x128xf32>
    tpu.vector_store %arg6[%236, %c0_109], %233 {strides = array<i32>} : memref<64x128xf32, #tpu.memory_space<vmem>>, vector<8x128xf32>,
    %c6_i32 = arith.constant 6 : i32
    %c8_i32_110 = arith.constant 8 : i32
    %238 = arith.muli %c6_i32, %c8_i32_110 : i32
    %239 = tpu.assume_multiple %238, 8 : i32
    %240 = arith.index_cast %239 : i32 to index
    %c0_111 = arith.constant 0 : index
    %241 = vector.load %arg10[%240, %c0_111] : memref<64x512xf32, #tpu.memory_space<vmem>>, vector<8x512xf32>
    %c0_112 = arith.constant 0 : index
    %c0_113 = arith.constant 0 : index
    %242 = vector.load %arg8[%c0_112, %c0_113] : memref<8x128xf32, #tpu.memory_space<vmem>>, vector<8x128xf32>
    %c0_114 = arith.constant 0 : index
    %c0_115 = arith.constant 0 : index
    %243 = vector.load %arg4[%c0_114, %c0_115] : memref<128x512xf32, #tpu.memory_space<vmem>>, vector<128x512xf32>
    %cst_116 = arith.constant dense<0.000000e+00> : vector<8x512xf32>
    %244 = tpu.matmul %242, %243, %cst_116 {dimension_numbers = #tpu.dot_dimension_numbers<[1], [0], [0], [1], [0, 0, 1, 1], [], []>} : vector<8x128xf32>, vector<128x512xf32>, vector<8x512xf32> -> vector<8x512xf32>
    %245 = arith.addf %241, %244 : vector<8x512xf32>
    %246 = vector.extract_strided_slice %245 {offsets = [0, 0], sizes = [8, 128], strides = [1, 1]} : vector<8x512xf32> to vector<8x128xf32>
    %247 = arith.negf %246 : vector<8x128xf32>
    %248 = math.exp %247 : vector<8x128xf32>
    %cst_117 = arith.constant 1.000000e+00 : f32
    %249 = vector.broadcast %cst_117 : f32 to vector<8x128xf32>
    %250 = arith.addf %249, %248 : vector<8x128xf32>
    %251 = arith.divf %249, %250 : vector<8x128xf32>
    %252 = vector.extract_strided_slice %245 {offsets = [0, 128], sizes = [8, 128], strides = [1, 1]} : vector<8x512xf32> to vector<8x128xf32>
    %253 = arith.negf %252 : vector<8x128xf32>
    %254 = math.exp %253 : vector<8x128xf32>
    %cst_118 = arith.constant 1.000000e+00 : f32
    %255 = vector.broadcast %cst_118 : f32 to vector<8x128xf32>
    %256 = arith.addf %255, %254 : vector<8x128xf32>
    %257 = arith.divf %255, %256 : vector<8x128xf32>
    %258 = vector.extract_strided_slice %245 {offsets = [0, 256], sizes = [8, 128], strides = [1, 1]} : vector<8x512xf32> to vector<8x128xf32>
    %259 = math.tanh %258 : vector<8x128xf32>
    %260 = vector.extract_strided_slice %245 {offsets = [0, 384], sizes = [8, 128], strides = [1, 1]} : vector<8x512xf32> to vector<8x128xf32>
    %261 = arith.negf %260 : vector<8x128xf32>
    %262 = math.exp %261 : vector<8x128xf32>
    %cst_119 = arith.constant 1.000000e+00 : f32
    %263 = vector.broadcast %cst_119 : f32 to vector<8x128xf32>
    %264 = arith.addf %263, %262 : vector<8x128xf32>
    %265 = arith.divf %263, %264 : vector<8x128xf32>
    %c0_120 = arith.constant 0 : index
    %c0_121 = arith.constant 0 : index
    %266 = vector.load %arg9[%c0_120, %c0_121] : memref<8x128xf32, #tpu.memory_space<vmem>>, vector<8x128xf32>
    %267 = arith.mulf %257, %266 : vector<8x128xf32>
    %268 = arith.mulf %251, %259 : vector<8x128xf32>
    %269 = arith.addf %267, %268 : vector<8x128xf32>
    %270 = math.tanh %269 : vector<8x128xf32>
    %271 = arith.mulf %265, %270 : vector<8x128xf32>
    %c0_122 = arith.constant 0 : index
    %c0_123 = arith.constant 0 : index
    %272 = vector.load %arg8[%c0_122, %c0_123] : memref<8x128xf32, #tpu.memory_space<vmem>>, vector<8x128xf32>
    tpu.vector_store %arg8[%c0_122, %c0_123], %271 {strides = array<i32>} : memref<8x128xf32, #tpu.memory_space<vmem>>, vector<8x128xf32>,
    %c0_124 = arith.constant 0 : index
    %c0_125 = arith.constant 0 : index
    %273 = vector.load %arg9[%c0_124, %c0_125] : memref<8x128xf32, #tpu.memory_space<vmem>>, vector<8x128xf32>
    tpu.vector_store %arg9[%c0_124, %c0_125], %269 {strides = array<i32>} : memref<8x128xf32, #tpu.memory_space<vmem>>, vector<8x128xf32>,
    %274 = arith.index_cast %239 : i32 to index
    %c0_126 = arith.constant 0 : index
    %275 = vector.load %arg6[%274, %c0_126] : memref<64x128xf32, #tpu.memory_space<vmem>>, vector<8x128xf32>
    tpu.vector_store %arg6[%274, %c0_126], %271 {strides = array<i32>} : memref<64x128xf32, #tpu.memory_space<vmem>>, vector<8x128xf32>,
    %c7_i32 = arith.constant 7 : i32
    %c8_i32_127 = arith.constant 8 : i32
    %276 = arith.muli %c7_i32, %c8_i32_127 : i32
    %277 = tpu.assume_multiple %276, 8 : i32
    %278 = arith.index_cast %277 : i32 to index
    %c0_128 = arith.constant 0 : index
    %279 = vector.load %arg10[%278, %c0_128] : memref<64x512xf32, #tpu.memory_space<vmem>>, vector<8x512xf32>
    %c0_129 = arith.constant 0 : index
    %c0_130 = arith.constant 0 : index
    %280 = vector.load %arg8[%c0_129, %c0_130] : memref<8x128xf32, #tpu.memory_space<vmem>>, vector<8x128xf32>
    %c0_131 = arith.constant 0 : index
    %c0_132 = arith.constant 0 : index
    %281 = vector.load %arg4[%c0_131, %c0_132] : memref<128x512xf32, #tpu.memory_space<vmem>>, vector<128x512xf32>
    %cst_133 = arith.constant dense<0.000000e+00> : vector<8x512xf32>
    %282 = tpu.matmul %280, %281, %cst_133 {dimension_numbers = #tpu.dot_dimension_numbers<[1], [0], [0], [1], [0, 0, 1, 1], [], []>} : vector<8x128xf32>, vector<128x512xf32>, vector<8x512xf32> -> vector<8x512xf32>
    %283 = arith.addf %279, %282 : vector<8x512xf32>
    %284 = vector.extract_strided_slice %283 {offsets = [0, 0], sizes = [8, 128], strides = [1, 1]} : vector<8x512xf32> to vector<8x128xf32>
    %285 = arith.negf %284 : vector<8x128xf32>
    %286 = math.exp %285 : vector<8x128xf32>
    %cst_134 = arith.constant 1.000000e+00 : f32
    %287 = vector.broadcast %cst_134 : f32 to vector<8x128xf32>
    %288 = arith.addf %287, %286 : vector<8x128xf32>
    %289 = arith.divf %287, %288 : vector<8x128xf32>
    %290 = vector.extract_strided_slice %283 {offsets = [0, 128], sizes = [8, 128], strides = [1, 1]} : vector<8x512xf32> to vector<8x128xf32>
    %291 = arith.negf %290 : vector<8x128xf32>
    %292 = math.exp %291 : vector<8x128xf32>
    %cst_135 = arith.constant 1.000000e+00 : f32
    %293 = vector.broadcast %cst_135 : f32 to vector<8x128xf32>
    %294 = arith.addf %293, %292 : vector<8x128xf32>
    %295 = arith.divf %293, %294 : vector<8x128xf32>
    %296 = vector.extract_strided_slice %283 {offsets = [0, 256], sizes = [8, 128], strides = [1, 1]} : vector<8x512xf32> to vector<8x128xf32>
    %297 = math.tanh %296 : vector<8x128xf32>
    %298 = vector.extract_strided_slice %283 {offsets = [0, 384], sizes = [8, 128], strides = [1, 1]} : vector<8x512xf32> to vector<8x128xf32>
    %299 = arith.negf %298 : vector<8x128xf32>
    %300 = math.exp %299 : vector<8x128xf32>
    %cst_136 = arith.constant 1.000000e+00 : f32
    %301 = vector.broadcast %cst_136 : f32 to vector<8x128xf32>
    %302 = arith.addf %301, %300 : vector<8x128xf32>
    %303 = arith.divf %301, %302 : vector<8x128xf32>
    %c0_137 = arith.constant 0 : index
    %c0_138 = arith.constant 0 : index
    %304 = vector.load %arg9[%c0_137, %c0_138] : memref<8x128xf32, #tpu.memory_space<vmem>>, vector<8x128xf32>
    %305 = arith.mulf %295, %304 : vector<8x128xf32>
    %306 = arith.mulf %289, %297 : vector<8x128xf32>
    %307 = arith.addf %305, %306 : vector<8x128xf32>
    %308 = math.tanh %307 : vector<8x128xf32>
    %309 = arith.mulf %303, %308 : vector<8x128xf32>
    %c0_139 = arith.constant 0 : index
    %c0_140 = arith.constant 0 : index
    %310 = vector.load %arg8[%c0_139, %c0_140] : memref<8x128xf32, #tpu.memory_space<vmem>>, vector<8x128xf32>
    tpu.vector_store %arg8[%c0_139, %c0_140], %309 {strides = array<i32>} : memref<8x128xf32, #tpu.memory_space<vmem>>, vector<8x128xf32>,
    %c0_141 = arith.constant 0 : index
    %c0_142 = arith.constant 0 : index
    %311 = vector.load %arg9[%c0_141, %c0_142] : memref<8x128xf32, #tpu.memory_space<vmem>>, vector<8x128xf32>
    tpu.vector_store %arg9[%c0_141, %c0_142], %307 {strides = array<i32>} : memref<8x128xf32, #tpu.memory_space<vmem>>, vector<8x128xf32>,
    %312 = arith.index_cast %277 : i32 to index
    %c0_143 = arith.constant 0 : index
    %313 = vector.load %arg6[%312, %c0_143] : memref<64x128xf32, #tpu.memory_space<vmem>>, vector<8x128xf32>
    tpu.vector_store %arg6[%312, %c0_143], %309 {strides = array<i32>} : memref<64x128xf32, #tpu.memory_space<vmem>>, vector<8x128xf32>,
    %c8_i32_144 = arith.constant 8 : i32
    %c0_i32_145 = arith.constant 0 : i32
    %314 = arith.cmpi eq, %arg1, %c0_i32_145 : i32
    %315 = arith.extui %314 : i1 to i32
    %c0_i32_146 = arith.constant 0 : i32
    %316 = arith.cmpi ne, %315, %c0_i32_146 : i32
    scf.if %316 {
      %c0_147 = arith.constant 0 : index
      %c0_148 = arith.constant 0 : index
      %317 = vector.load %arg9[%c0_147, %c0_148] : memref<8x128xf32, #tpu.memory_space<vmem>>, vector<8x128xf32>
      %c0_149 = arith.constant 0 : index
      %c0_150 = arith.constant 0 : index
      %318 = vector.load %arg7[%c0_149, %c0_150] : memref<8x128xf32, #tpu.memory_space<vmem>>, vector<8x128xf32>
      tpu.vector_store %arg7[%c0_149, %c0_150], %317 {strides = array<i32>} : memref<8x128xf32, #tpu.memory_space<vmem>>, vector<8x128xf32>,
    } else {
    }
    return
  }
  func.func @transform_0(%arg0: i32, %arg1: i32) -> (i32, i32) {
    %c1_i32 = arith.constant 1 : i32
    %0 = arith.muli %arg0, %c1_i32 : i32
    %1 = arith.addi %0, %arg1 : i32
    %c0_i32 = arith.constant 0 : i32
    %c0_i32_0 = arith.constant 0 : i32
    return %1, %c0_i32 : i32, i32
  }
  func.func @transform_1(%arg0: i32, %arg1: i32) -> (i32, i32) {
    %c0_i32 = arith.constant 0 : i32
    %c0_i32_0 = arith.constant 0 : i32
    %c0_i32_1 = arith.constant 0 : i32
    return %c0_i32, %c0_i32_0 : i32, i32
  }
  func.func @transform_2(%arg0: i32, %arg1: i32) -> (i32, i32) {
    %c0_i32 = arith.constant 0 : i32
    %c0_i32_0 = arith.constant 0 : i32
    %c0_i32_1 = arith.constant 0 : i32
    return %c0_i32, %c0_i32_0 : i32, i32
  }
  func.func @transform_3(%arg0: i32, %arg1: i32) -> (i32, i32) {
    %c0_i32 = arith.constant 0 : i32
    %c0_i32_0 = arith.constant 0 : i32
    %c0_i32_1 = arith.constant 0 : i32
    return %c0_i32, %c0_i32_0 : i32, i32
  }
  func.func @transform_4(%arg0: i32, %arg1: i32) -> (i32, i32) {
    %c1_i32 = arith.constant 1 : i32
    %0 = arith.muli %arg0, %c1_i32 : i32
    %1 = arith.addi %0, %arg1 : i32
    %c0_i32 = arith.constant 0 : i32
    %c0_i32_0 = arith.constant 0 : i32
    return %1, %c0_i32 : i32, i32
  }
  func.func @transform_5(%arg0: i32, %arg1: i32) -> (i32, i32) {
    %c0_i32 = arith.constant 0 : i32
    %c0_i32_0 = arith.constant 0 : i32
    return %arg0, %c0_i32 : i32, i32
  }
}

</mosaic_0001>

<bundles_post_ra>
// kernel: encoder_forward.2
= control target key start
LH: loop header
LB: loop body
LE: loop exit
PB: predicated region body
PF: predicated region fallthrough
CT: control target
= control target key end

     0   :  { %11 = vsyncpa [#allocation6], 0  ;;  %s4008_s0 = inlined_call_operand.hbm [shape: f32[64,128], index: 0, kind: input, shape index: {}]   ;;  %s4009_s1 = inlined_call_operand.hbm [shape: f32[128,512], index: 1, kind: input, shape index: {}]   ;;  %s4010_s2 = inlined_call_operand.hbm [shape: f32[128,512], index: 2, kind: input, shape index: {}]   ;;  %s4011_s3 = inlined_call_operand.hbm [shape: f32[1,512], index: 3, kind: input, shape index: {}]   ;;  %s4012_s4 = inlined_call_operand.hbm [shape: f32[64,128], index: 4, kind: output, shape index: {0}]   ;;  %s4013_s5 = inlined_call_operand.hbm [shape: f32[8,128], index: 5, kind: output, shape index: {1}]  }
   0x1   :  { %12 = vsyncpa [#allocation9], 0 }
   0x2   :  { %13 = vsyncpa [#allocation12], 0 }
   0x3   :  { %14 = vsyncpa [#allocation7], 0 }
   0x4   :  { %15 = vsyncpa [#allocation15], 0  ;;  %s3409_s18 = smov [#allocation8]   ;;  %s3267_s22 = scalar_lea.hbm %s4009_s1, 8192 }
   0x5   :  { %s37_s19 = sshll.u32 %s3409_s18, 4  ;;  %p3268_p0 = scmp.ne.s32.totalorder %s4009_s1, %s3267_s22  ;;  %s38_s19 = int_to_ptr.vmem [resolvable:$true] %s37_s19 }
   0x6   :  { %p3271_p1 = scmp.lt.u32.totalorder %s3267_s22, %s4009_s1 }
   0x8   :  { %p3273_p2 = pnand %p3271_p1, %p3268_p0 }
   0xa   :  { %3276 = shalt.err (!%p3273_p2)
}
   0xb   :  { %s3277_s27 = scalar_lea.vmem %s38_s19, 8192  ;;  %p3282_p4 = scmp.lt.s32.totalorder %s38_s19, %s38_s19 }
   0xc   :  { %p3278_p3 = scmp.ne.s32.totalorder %s38_s19, %s3277_s27  ;;  %p3283_p5 = scmp.lt.s32.totalorder %s3277_s27, %s3277_s27 }
   0xe   :  { %p3284_p6 = por %p3283_p5, %p3282_p4 }
  0x10   :  { %p3285_p7 = pnand %p3284_p6, %p3278_p3 }
  0x12   :  { %3288 = shalt.err (!%p3285_p7)
}
  0x13   :  { %s3410_s28 = smov 512   ;;  %s3411_s29 = smov 32  }
  0x14   :  { %43 = dma.hbm_to_vmem [thread:$0]  %s4009_s1, 8192, %s38_s19, [#allocation9], %s3410_s28, %s3410_s28, %s3411_s29  }
  0x15   :  { %s3412_s7 = smov [#allocation5]   ;;  %s3289_s11 = scalar_lea.hbm %s4008_s0, 1024 }
  0x16   :  { %s25_s8 = sshll.u32 %s3412_s7, 4  ;;  %p3290_p8 = scmp.ne.s32.totalorder %s4008_s0, %s3289_s11  ;;  %s26_s8 = int_to_ptr.vmem [resolvable:$true] %s25_s8 }
  0x17   :  { %p3293_p9 = scmp.lt.u32.totalorder %s3289_s11, %s4008_s0 }
  0x19   :  { %p3295_p10 = pnand %p3293_p9, %p3290_p8 }
  0x1b   :  { %3298 = shalt.err (!%p3295_p10)
}
  0x1c   :  { %s3299_s16 = scalar_lea.vmem %s26_s8, 1024  ;;  %p3304_p12 = scmp.lt.s32.totalorder %s26_s8, %s26_s8 }
  0x1d   :  { %p3300_p11 = scmp.ne.s32.totalorder %s26_s8, %s3299_s16  ;;  %p3305_p13 = scmp.lt.s32.totalorder %s3299_s16, %s3299_s16 }
  0x1f   :  { %p3306_p0 = por %p3305_p13, %p3304_p12 }
  0x21   :  { %p3307_p1 = pnand %p3306_p0, %p3300_p11 }
  0x23   :  { %3310 = shalt.err (!%p3307_p1)
}
  0x24   :  { %s3413_s1 = smov 128   ;;  %s3414_s17 = smov 8  }
  0x25   :  { %31 = dma.hbm_to_vmem [thread:$0]  %s4008_s0, 1024, %s26_s8, [#allocation6], %s3413_s1, %s3413_s1, %s3414_s17  }
  0x26   :  { %s3415_s20 = smov [#allocation10]   ;;  %s3416_s22 = smov [#allocation11]  }
  0x27   :  { %s49_s21 = sshll.u32 %s3415_s20, 4  ;;  %s62_s23 = sshll.u32 %s3416_s22, 4  ;;  %s50_s21 = int_to_ptr.vmem [resolvable:$true] %s49_s21  ;;  %s63_s23 = int_to_ptr.vmem [resolvable:$true] %s62_s23 }
  0x28   :  { %s3311_s26 = scalar_lea.hbm %s4010_s2, 8192 }
  0x29   :  { %p3312_p2 = scmp.ne.s32.totalorder %s4010_s2, %s3311_s26  ;;  %p3315_p3 = scmp.lt.u32.totalorder %s3311_s26, %s4010_s2 }
  0x2b   :  { %p3317_p4 = pnand %p3315_p3, %p3312_p2 }
  0x2d   :  { %3320 = shalt.err (!%p3317_p4)
}
  0x2e   :  { %s3321_s0 = scalar_lea.vmem %s50_s21, 8192  ;;  %p3326_p6 = scmp.lt.s32.totalorder %s50_s21, %s50_s21 }
  0x2f   :  { %p3322_p5 = scmp.ne.s32.totalorder %s50_s21, %s3321_s0  ;;  %p3327_p7 = scmp.lt.s32.totalorder %s3321_s0, %s3321_s0 }
  0x31   :  { %p3328_p8 = por %p3327_p7, %p3326_p6 }
  0x33   :  { %p3329_p9 = pnand %p3328_p8, %p3322_p5 }
  0x35   :  { %3332 = shalt.err (!%p3329_p9)
}
  0x36   :  { %55 = dma.hbm_to_vmem [thread:$0]  %s4010_s2, 8192, %s50_s21, [#allocation9], %s3410_s28, %s3410_s28, %s3411_s29  }
  0x37   :  { %s3333_s12 = scalar_lea.hbm %s4011_s3, 64 }
  0x38   :  { %p3334_p10 = scmp.ne.s32.totalorder %s4011_s3, %s3333_s12  ;;  %p3337_p11 = scmp.lt.u32.totalorder %s3333_s12, %s4011_s3 }
  0x3a   :  { %p3339_p12 = pnand %p3337_p11, %p3334_p10 }
  0x3c   :  { %3342 = shalt.err (!%p3339_p12)
}
  0x3d   :  { %s3343_s18 = scalar_lea.vmem %s63_s23, 64  ;;  %p3348_p0 = scmp.lt.s32.totalorder %s63_s23, %s63_s23 }
  0x3e   :  { %p3344_p13 = scmp.ne.s32.totalorder %s63_s23, %s3343_s18  ;;  %p3349_p1 = scmp.lt.s32.totalorder %s3343_s18, %s3343_s18 }
  0x40   :  { %p3350_p2 = por %p3349_p1, %p3348_p0 }
  0x42   :  { %p3351_p3 = pnand %p3350_p2, %p3344_p13 }
  0x44   :  { %3354 = shalt.err (!%p3351_p3)
}
  0x45   :  { %65 = dma.hbm_to_vmem [thread:$0]  %s4011_s3, 64, %s63_s23, [#allocation12]  }
  0x46   :  { %3399 = dma.done.wait [#allocation6], 1024  }
  0x47   :  { %3400 = vsyncadd [#allocation6], 4294966272 }
  0x48   :  { %3401 = dma.done.wait [#allocation9], 16384  }
  0x49   :  { %3402 = vsyncadd [#allocation9], 4294950912 }
  0x4a   :  { %3403 = dma.done.wait [#allocation12], 64  }
  0x4b   :  { %3404 = vsyncadd [#allocation12], 4294967232  ;;  %v3417_v0 = vmov 0.0   ;;  %v97_v1 = vld [vmem:[#allocation8 + $0x8] sm:$0xff]  ;;  %v99_v3 = vld [vmem:[#allocation8 + $0x18] sm:$0xff]  ;;  %s3418_s3 = smov [#allocation14]  }
  0x4c   :  { %246 = vmatprep.mubr.f32.mxu0 %v3417_v0  ;;  %359 = vmatprep.mubr.f32.mxu1 %v3417_v0  ;;  %v101_v2 = vld [vmem:[#allocation8 + $0x28] sm:$0xff]  ;;  %v103_v5 = vld [vmem:[#allocation8 + $0x38] sm:$0xff]  ;;  %v96_v6 = vld [vmem:[#allocation8] sm:$0xff]  ;;  %s2442_s29 = sshll.u32 %s3418_s3, 4  ;;  %s2443_s29 = int_to_ptr.vmem [resolvable:$true] %s2442_s29 }
  0x4d   :  { %v2488_v4 = vpack.c.bf16 %v101_v2, %v97_v1  ;;  %v100_v7 = vld [vmem:[#allocation8 + $0x20] sm:$0xff]  ;;  %v2520_v8 = vpack.c.bf16 %v103_v5, %v99_v3  ;;  %v98_v10 = vld [vmem:[#allocation8 + $0x10] sm:$0xff]  ;;  %v105_v12 = vld [vmem:[#allocation8 + $0x48] sm:$0xff]  ;;  %s3355_s19 = scalar_lea.vmem %s2443_s29, 128  ;;  %p3360_p5 = scmp.lt.s32.totalorder %s2443_s29, %s2443_s29 }
  0x4e   :  { %v2490_v9 = vpack.c.bf16 %v100_v7, %v96_v6  ;;  %v102_v11 = vld [vmem:[#allocation8 + $0x30] sm:$0xff]  ;;  %v109_v14 = vld [vmem:[#allocation8 + $0x68] sm:$0xff]  ;;  %v107_v15 = vld [vmem:[#allocation8 + $0x58] sm:$0xff]  ;;  %p3356_p4 = scmp.ne.s32.totalorder %s2443_s29, %s3355_s19  ;;  %p3361_p6 = scmp.lt.s32.totalorder %s3355_s19, %s3355_s19 }
  0x4f   :  { %2489 = vmatprep.subr.bf16.mxu0 %v2488_v4  ;;  %v2522_v13 = vpack.c.bf16 %v102_v11, %v98_v10  ;;  %v111_v16 = vld [vmem:[#allocation8 + $0x78] sm:$0xff]  ;;  %2521 = vmatprep.subr.bf16.mxu1 %v2520_v8  ;;  %v2492_v17 = vpack.c.bf16 %v109_v14, %v105_v12  ;;  %v104_v19 = vld [vmem:[#allocation8 + $0x40] sm:$0xff]  ;;  %v106_v21 = vld [vmem:[#allocation8 + $0x50] sm:$0xff] }
  0x50   :  { %2491 = vmatpush1.bf16.msra.mxu0 %v2490_v9  ;;  %v2524_v18 = vpack.c.bf16 %v111_v16, %v107_v15  ;;  %v108_v20 = vld [vmem:[#allocation8 + $0x60] sm:$0xff]  ;;  %v110_v23 = vld [vmem:[#allocation8 + $0x70] sm:$0xff]  ;;  %v113_v24 = vld [vmem:[#allocation8 + $0x88] sm:$0xff]  ;;  %p3362_p7 = por %p3361_p6, %p3360_p5 }
  0x51   :  { %2523 = vmatpush1.bf16.msra.mxu1 %v2522_v13  ;;  %v2494_v22 = vpack.c.bf16 %v108_v20, %v104_v19  ;;  %v117_v25 = vld [vmem:[#allocation8 + $0xa8] sm:$0xff]  ;;  %2493 = vmatprep.subr.bf16.mxu0 %v2492_v17  ;;  %v2526_v26 = vpack.c.bf16 %v110_v23, %v106_v21  ;;  %v115_v28 = vld [vmem:[#allocation8 + $0x98] sm:$0xff]  ;;  %v112_v30 = vld [vmem:[#allocation8 + $0x80] sm:$0xff] }
  0x52   :  { %2525 = vmatprep.subr.bf16.mxu1 %v2524_v18  ;;  %v2496_v27 = vpack.c.bf16 %v117_v25, %v113_v24  ;;  %v119_v29 = vld [vmem:[#allocation8 + $0xb8] sm:$0xff]  ;;  %v116_v32 = vld [vmem:[#allocation8 + $0xa0] sm:$0xff]  ;;  %v114_v33 = vld [vmem:[#allocation8 + $0x90] sm:$0xff]  ;;  %p3363_p8 = pnand %p3362_p7, %p3356_p4 }
  0x53   :  { %v2528_v31 = vpack.c.bf16 %v119_v29, %v115_v28  ;;  %v118_v34 = vld [vmem:[#allocation8 + $0xb0] sm:$0xff]  ;;  %v2498_v35 = vpack.c.bf16 %v116_v32, %v112_v30  ;;  %v121_v36 = vld [vmem:[#allocation8 + $0xc8] sm:$0xff]  ;;  %v123_v38 = vld [vmem:[#allocation8 + $0xd8] sm:$0xff] }
  0x54   :  { %2495 = vmatpush1.bf16.msra.mxu0 %v2494_v22  ;;  %v125_v37 = vld [vmem:[#allocation8 + $0xe8] sm:$0xff]  ;;  %v2530_v39 = vpack.c.bf16 %v118_v34, %v114_v33  ;;  %v127_v41 = vld [vmem:[#allocation8 + $0xf8] sm:$0xff]  ;;  %v120_v42 = vld [vmem:[#allocation8 + $0xc0] sm:$0xff] }
  0x55   :  { %2527 = vmatpush1.bf16.msra.mxu1 %v2526_v26  ;;  %2497 = vmatprep.subr.bf16.mxu0 %v2496_v27  ;;  %v2500_v40 = vpack.c.bf16 %v125_v37, %v121_v36  ;;  %v124_v43 = vld [vmem:[#allocation8 + $0xe0] sm:$0xff]  ;;  %v2532_v44 = vpack.c.bf16 %v127_v41, %v123_v38  ;;  %v122_v45 = vld [vmem:[#allocation8 + $0xd0] sm:$0xff]  ;;  %v129_v47 = vld [vmem:[#allocation8 + $0x108] sm:$0xff] }
  0x56   :  { %2529 = vmatprep.subr.bf16.mxu1 %v2528_v31  ;;  %v126_v46 = vld [vmem:[#allocation8 + $0xf0] sm:$0xff]  ;;  %v133_v48 = vld [vmem:[#allocation8 + $0x128] sm:$0xff]  ;;  %v131_v49 = vld [vmem:[#allocation8 + $0x118] sm:$0xff]  ;;  %v2502_v51 = vpack.c.bf16 %v124_v43, %v120_v42 }
  0x57   :  { %v135_v50 = vld [vmem:[#allocation8 + $0x138] sm:$0xff]  ;;  %v2534_v52 = vpack.c.bf16 %v126_v46, %v122_v45  ;;  %v2504_v53 = vpack.c.bf16 %v133_v48, %v129_v47  ;;  %v128_v54 = vld [vmem:[#allocation8 + $0x100] sm:$0xff]  ;;  %v130_v56 = vld [vmem:[#allocation8 + $0x110] sm:$0xff] }
  0x58   :  { %2499 = vmatpush1.bf16.msra.mxu0 %v2498_v35  ;;  %v132_v55 = vld [vmem:[#allocation8 + $0x120] sm:$0xff]  ;;  %v2536_v57 = vpack.c.bf16 %v135_v50, %v131_v49  ;;  %v134_v58 = vld [vmem:[#allocation8 + $0x130] sm:$0xff]  ;;  %v137_v59 = vld [vmem:[#allocation8 + $0x148] sm:$0xff] }
  0x59   :  { %2531 = vmatpush1.bf16.msra.mxu1 %v2530_v39  ;;  %2501 = vmatprep.subr.bf16.mxu0 %v2500_v40  ;;  %v141_v60 = vld [vmem:[#allocation8 + $0x168] sm:$0xff]  ;;  %v139_v61 = vld [vmem:[#allocation8 + $0x158] sm:$0xff]  ;;  %v2506_v63 = vpack.c.bf16 %v132_v55, %v128_v54  ;;  %v2538_v1 = vpack.c.bf16 %v134_v58, %v130_v56  ;;  %v136_v3 = vld [vmem:[#allocation8 + $0x140] sm:$0xff] }
  0x5a   :  { %2533 = vmatprep.subr.bf16.mxu1 %v2532_v44  ;;  %v143_v62 = vld [vmem:[#allocation8 + $0x178] sm:$0xff]  ;;  %v2508_v2 = vpack.c.bf16 %v141_v60, %v137_v59  ;;  %v140_v4 = vld [vmem:[#allocation8 + $0x160] sm:$0xff]  ;;  %v138_v5 = vld [vmem:[#allocation8 + $0x150] sm:$0xff] }
  0x5b   :  { %v2540_v6 = vpack.c.bf16 %v143_v62, %v139_v61  ;;  %v142_v7 = vld [vmem:[#allocation8 + $0x170] sm:$0xff]  ;;  %v145_v8 = vld [vmem:[#allocation8 + $0x188] sm:$0xff]  ;;  %v147_v10 = vld [vmem:[#allocation8 + $0x198] sm:$0xff]  ;;  %v2510_v12 = vpack.c.bf16 %v140_v4, %v136_v3 }
  0x5c   :  { %2503 = vmatpush1.bf16.msra.mxu0 %v2502_v51  ;;  %v149_v9 = vld [vmem:[#allocation8 + $0x1a8] sm:$0xff]  ;;  %v151_v11 = vld [vmem:[#allocation8 + $0x1b8] sm:$0xff]  ;;  %v2542_v13 = vpack.c.bf16 %v142_v7, %v138_v5  ;;  %v144_v15 = vld [vmem:[#allocation8 + $0x180] sm:$0xff] }
  0x5d   :  { %2535 = vmatpush1.bf16.msra.mxu1 %v2534_v52  ;;  %2505 = vmatprep.subr.bf16.mxu0 %v2504_v53  ;;  %v2512_v14 = vpack.c.bf16 %v149_v9, %v145_v8  ;;  %v148_v16 = vld [vmem:[#allocation8 + $0x1a0] sm:$0xff]  ;;  %v146_v17 = vld [vmem:[#allocation8 + $0x190] sm:$0xff]  ;;  %v2544_v18 = vpack.c.bf16 %v151_v11, %v147_v10  ;;  %v153_v20 = vld [vmem:[#allocation8 + $0x1c8] sm:$0xff] }
  0x5e   :  { %2537 = vmatprep.subr.bf16.mxu1 %v2536_v57  ;;  %v150_v19 = vld [vmem:[#allocation8 + $0x1b0] sm:$0xff]  ;;  %v157_v21 = vld [vmem:[#allocation8 + $0x1e8] sm:$0xff]  ;;  %v155_v22 = vld [vmem:[#allocation8 + $0x1d8] sm:$0xff]  ;;  %v2514_v24 = vpack.c.bf16 %v148_v16, %v144_v15 }
  0x5f   :  { %v159_v23 = vld [vmem:[#allocation8 + $0x1f8] sm:$0xff]  ;;  %v2546_v25 = vpack.c.bf16 %v150_v19, %v146_v17  ;;  %v2516_v26 = vpack.c.bf16 %v157_v21, %v153_v20  ;;  %v152_v27 = vld [vmem:[#allocation8 + $0x1c0] sm:$0xff]  ;;  %v154_v29 = vld [vmem:[#allocation8 + $0x1d0] sm:$0xff] }
  0x60   :  { %2507 = vmatpush1.bf16.msra.mxu0 %v2506_v63  ;;  %v156_v28 = vld [vmem:[#allocation8 + $0x1e0] sm:$0xff]  ;;  %v2548_v30 = vpack.c.bf16 %v159_v23, %v155_v22  ;;  %v158_v31 = vld [vmem:[#allocation8 + $0x1f0] sm:$0xff]  ;;  %v449_v32 = vld [vmem:[#allocation10 + $0x8] sm:$0xff] }
  0x61   :  { %2539 = vmatpush1.bf16.msra.mxu1 %v2538_v1  ;;  %2509 = vmatprep.subr.bf16.mxu0 %v2508_v2  ;;  %v453_v33 = vld [vmem:[#allocation10 + $0x28] sm:$0xff]  ;;  %v451_v34 = vld [vmem:[#allocation10 + $0x18] sm:$0xff]  ;;  %v2518_v36 = vpack.c.bf16 %v156_v28, %v152_v27  ;;  %v2550_v37 = vpack.c.bf16 %v158_v31, %v154_v29  ;;  %v448_v39 = vld [vmem:[#allocation10] sm:$0xff] }
  0x62   :  { %2541 = vmatprep.subr.bf16.mxu1 %v2540_v6  ;;  %v455_v35 = vld [vmem:[#allocation10 + $0x38] sm:$0xff]  ;;  %v3509_v38 = vpack.c.bf16 %v453_v33, %v449_v32  ;;  %v452_v40 = vld [vmem:[#allocation10 + $0x20] sm:$0xff]  ;;  %v450_v42 = vld [vmem:[#allocation10 + $0x10] sm:$0xff] }
  0x63   :  { %v3511_v41 = vpack.c.bf16 %v455_v35, %v451_v34  ;;  %v454_v43 = vld [vmem:[#allocation10 + $0x30] sm:$0xff]  ;;  %v457_v44 = vld [vmem:[#allocation10 + $0x48] sm:$0xff]  ;;  %v88_v46 = vld [vmem:[#allocation5] sm:$0xff]  ;;  %v3513_v47 = vpack.c.bf16 %v452_v40, %v448_v39 }
  0x64   :  { %2511 = vmatpush1.bf16.msra.mxu0 %v2510_v12  ;;  %v461_v45 = vld [vmem:[#allocation10 + $0x68] sm:$0xff]  ;;  %v459_v48 = vld [vmem:[#allocation10 + $0x58] sm:$0xff]  ;;  %v3516_v50 = vpack.c.bf16 %v454_v43, %v450_v42  ;;  %v456_v51 = vld [vmem:[#allocation10 + $0x40] sm:$0xff] }
  0x65   :  { %2543 = vmatpush1.bf16.msra.mxu1 %v2542_v13  ;;  %2513 = vmatprep.subr.bf16.mxu0 %v2512_v14  ;;  %v463_v49 = vld [vmem:[#allocation10 + $0x78] sm:$0xff]  ;;  %v460_v52 = vld [vmem:[#allocation10 + $0x60] sm:$0xff]  ;;  %v3519_v53 = vpack.c.bf16 %v461_v45, %v457_v44  ;;  %v458_v54 = vld [vmem:[#allocation10 + $0x50] sm:$0xff] }
  0x66   :  { %2545 = vmatprep.subr.bf16.mxu1 %v2544_v18  ;;  %v462_v55 = vld [vmem:[#allocation10 + $0x70] sm:$0xff]  ;;  %v3521_v56 = vpack.c.bf16 %v463_v49, %v459_v48  ;;  %v465_v57 = vld [vmem:[#allocation10 + $0x88] sm:$0xff]  ;;  %v3524_v60 = vpack.c.bf16 %v460_v52, %v456_v51  ;;  %v467_v61 = vld [vmem:[#allocation10 + $0x98] sm:$0xff] }
  0x67   :  { %v469_v58 = vld [vmem:[#allocation10 + $0xa8] sm:$0xff]  ;;  %v471_v62 = vld [vmem:[#allocation10 + $0xb8] sm:$0xff]  ;;  %v3528_v63 = vpack.c.bf16 %v462_v55, %v458_v54  ;;  %v464_v1 = vld [vmem:[#allocation10 + $0x80] sm:$0xff] }
  0x68   :  { %2515 = vmatpush1.bf16.msra.mxu0 %v2514_v24  ;;  %v89_v59 = vld [vmem:[#allocation5 + $0x8] sm:$0xff]  ;;  %v468_v2 = vld [vmem:[#allocation10 + $0xa0] sm:$0xff]  ;;  %v3532_v3 = vpack.c.bf16 %v469_v58, %v465_v57  ;;  %v466_v4 = vld [vmem:[#allocation10 + $0x90] sm:$0xff]  ;;  %v3535_v6 = vpack.c.bf16 %v471_v62, %v467_v61 }
  0x69   :  { %2547 = vmatpush1.bf16.msra.mxu1 %v2546_v25  ;;  %2517 = vmatprep.subr.bf16.mxu0 %v2516_v26  ;;  %v470_v5 = vld [vmem:[#allocation10 + $0xb0] sm:$0xff]  ;;  %v473_v7 = vld [vmem:[#allocation10 + $0xc8] sm:$0xff]  ;;  %v3538_v10 = vpack.c.bf16 %v468_v2, %v464_v1  ;;  %v475_v11 = vld [vmem:[#allocation10 + $0xd8] sm:$0xff] }
  0x6a   :  { %2549 = vmatprep.subr.bf16.mxu1 %v2548_v30  ;;  %v477_v8 = vld [vmem:[#allocation10 + $0xe8] sm:$0xff]  ;;  %v90_v9 = vld [vmem:[#allocation5 + $0x10] sm:$0xff]  ;;  %v479_v12 = vld [vmem:[#allocation10 + $0xf8] sm:$0xff]  ;;  %v3542_v13 = vpack.c.bf16 %v470_v5, %v466_v4 }
  0x6b   :  { %v472_v14 = vld [vmem:[#allocation10 + $0xc0] sm:$0xff]  ;;  %v3546_v16 = vpack.c.bf16 %v477_v8, %v473_v7  ;;  %v474_v17 = vld [vmem:[#allocation10 + $0xd0] sm:$0xff]  ;;  %v3549_v19 = vpack.c.bf16 %v479_v12, %v475_v11  ;;  %v481_v20 = vld [vmem:[#allocation10 + $0x108] sm:$0xff] }
  0x6c   :  { %2519 = vmatpush1.bf16.msra.mxu0 %v2518_v36  ;;  %v476_v15 = vld [vmem:[#allocation10 + $0xe0] sm:$0xff]  ;;  %v478_v18 = vld [vmem:[#allocation10 + $0xf0] sm:$0xff]  ;;  %v485_v21 = vld [vmem:[#allocation10 + $0x128] sm:$0xff] }
  0x6d   :  { %2551 = vmatpush1.bf16.msra.mxu1 %v2550_v37  ;;  %2553 = vmatprep.subr.bf16.mxu0 %v3509_v38  ;;  %v91_v22 = vld [vmem:[#allocation5 + $0x18] sm:$0xff]  ;;  %v3552_v23 = vpack.c.bf16 %v476_v15, %v472_v14  ;;  %v3556_v26 = vpack.c.bf16 %v478_v18, %v474_v17  ;;  %v480_v27 = vld [vmem:[#allocation10 + $0x100] sm:$0xff]  ;;  %v3560_v29 = vpack.c.bf16 %v485_v21, %v481_v20  ;;  %v482_v30 = vld [vmem:[#allocation10 + $0x110] sm:$0xff] }
  0x6e   :  { %2585 = vmatprep.subr.bf16.mxu1 %v3511_v41  ;;  %v483_v24 = vld [vmem:[#allocation10 + $0x118] sm:$0xff]  ;;  %v484_v28 = vld [vmem:[#allocation10 + $0x120] sm:$0xff]  ;;  %v486_v31 = vld [vmem:[#allocation10 + $0x130] sm:$0xff] }
  0x6f   :  { %247 = vmatmul.mubr.f32.vlgmr.msra.gmra.mrb[0].mxu0 %v88_v46  ;;  %v487_v25 = vld [vmem:[#allocation10 + $0x138] sm:$0xff]  ;;  %v489_v33 = vld [vmem:[#allocation10 + $0x148] sm:$0xff]  ;;  %v92_v35 = vld [vmem:[#allocation5 + $0x20] sm:$0xff]  ;;  %v3566_v36 = vpack.c.bf16 %v484_v28, %v480_v27  ;;  %v3570_v40 = vpack.c.bf16 %v486_v31, %v482_v30  ;;  %v162_v28 = vlaneseq }
  0x70   :  { %360 = vmatmul.mubr.f32.vlgmr.msra.gmra.mrb[0].mxu1 %v88_v46  ;;  %2555 = vmatpush1.bf16.msra.mxu0 %v3513_v47  ;;  %v3563_v32 = vpack.c.bf16 %v487_v25, %v483_v24  ;;  %v493_v34 = vld [vmem:[#allocation10 + $0x168] sm:$0xff]  ;;  %v491_v37 = vld [vmem:[#allocation10 + $0x158] sm:$0xff]  ;;  %v488_v42 = vld [vmem:[#allocation10 + $0x140] sm:$0xff] }
  0x71   :  { %2587 = vmatpush1.bf16.msra.mxu1 %v3516_v50  ;;  %252 = vmatprep.mubr.f32.mxu0 %v3417_v0  ;;  %v495_v39 = vld [vmem:[#allocation10 + $0x178] sm:$0xff]  ;;  %v492_v43 = vld [vmem:[#allocation10 + $0x160] sm:$0xff]  ;;  %v3574_v44 = vpack.c.bf16 %v493_v34, %v489_v33  ;;  %v490_v45 = vld [vmem:[#allocation10 + $0x150] sm:$0xff]  ;;  %v163_v30 = vshrl.u32 %v162_v28, 7 }
  0x72   :  { %365 = vmatprep.mubr.f32.mxu1 %v3417_v0  ;;  %2557 = vmatprep.subr.bf16.mxu0 %v3519_v53  ;;  %v494_v46 = vld [vmem:[#allocation10 + $0x170] sm:$0xff]  ;;  %v3577_v48 = vpack.c.bf16 %v495_v39, %v491_v37  ;;  %v497_v49 = vld [vmem:[#allocation10 + $0x188] sm:$0xff]  ;;  %v3580_v54 = vpack.c.bf16 %v492_v43, %v488_v42  ;;  %v499_v55 = vld [vmem:[#allocation10 + $0x198] sm:$0xff] }
  0x73   :  { %253 = vmatmul.mubr.f32.gmra.mrb[2].mxu0 %v89_v59  ;;  %2589 = vmatprep.subr.bf16.mxu1 %v3521_v56  ;;  %v501_v51 = vld [vmem:[#allocation10 + $0x1a8] sm:$0xff]  ;;  %v503_v57 = vld [vmem:[#allocation10 + $0x1b8] sm:$0xff]  ;;  %v3584_v58 = vpack.c.bf16 %v494_v46, %v490_v45  ;;  %v500_v61 = vld [vmem:[#allocation10 + $0x1a0] sm:$0xff]  ;;  %v164_v31 = vsub.s32 0, %v163_v30  ;;  %v168_v34 = vsub.s32 1, %v163_v30  ;;  %v176_v42 = vsub.s32 3, %v163_v30 }
  0x74   :  { %366 = vmatmul.mubr.f32.gmra.mrb[2].mxu1 %v89_v59  ;;  %2559 = vmatpush1.bf16.msra.mxu0 %v3524_v60  ;;  %v93_v52 = vld [vmem:[#allocation5 + $0x28] sm:$0xff]  ;;  %v496_v59 = vld [vmem:[#allocation10 + $0x180] sm:$0xff]  ;;  %v3588_v62 = vpack.c.bf16 %v501_v51, %v497_v49  ;;  %v498_v1 = vld [vmem:[#allocation10 + $0x190] sm:$0xff]  ;;  %v3591_v4 = vpack.c.bf16 %v503_v57, %v499_v55  ;;  %v172_v55 = vsub.s32 2, %v163_v30 }
  0x75   :  { %2591 = vmatpush1.bf16.msra.mxu1 %v3528_v63  ;;  %258 = vmatprep.mubr.f32.mxu0 %v3417_v0  ;;  %v502_v2 = vld [vmem:[#allocation10 + $0x1b0] sm:$0xff]  ;;  %v505_v5 = vld [vmem:[#allocation10 + $0x1c8] sm:$0xff]  ;;  %v507_v11 = vld [vmem:[#allocation10 + $0x1d8] sm:$0xff] }
  0x76   :  { %371 = vmatprep.mubr.f32.mxu1 %v3417_v0  ;;  %2561 = vmatprep.subr.bf16.mxu0 %v3532_v3  ;;  %v509_v7 = vld [vmem:[#allocation10 + $0x1e8] sm:$0xff]  ;;  %v94_v8 = vld [vmem:[#allocation5 + $0x30] sm:$0xff]  ;;  %v511_v12 = vld [vmem:[#allocation10 + $0x1f8] sm:$0xff]  ;;  %v3598_v14 = vpack.c.bf16 %v502_v2, %v498_v1 }
  0x77   :  { %259 = vmatmul.mubr.f32.gmra.mrb[4].mxu0 %v90_v9  ;;  %2593 = vmatprep.subr.bf16.mxu1 %v3535_v6  ;;  %v504_v15 = vld [vmem:[#allocation10 + $0x1c0] sm:$0xff]  ;;  %v3602_v18 = vpack.c.bf16 %v509_v7, %v505_v5  ;;  %v506_v20 = vld [vmem:[#allocation10 + $0x1d0] sm:$0xff]  ;;  %v95_v24 = vld [vmem:[#allocation5 + $0x38] sm:$0xff] }
  0x78   :  { %372 = vmatmul.mubr.f32.gmra.mrb[4].mxu1 %v90_v9  ;;  %2563 = vmatpush1.bf16.msra.mxu0 %v3538_v10  ;;  %v3594_v9 = vpack.c.bf16 %v500_v61, %v496_v59  ;;  %v508_v17 = vld [vmem:[#allocation10 + $0x1e0] sm:$0xff]  ;;  %v510_v21 = vld [vmem:[#allocation10 + $0x1f0] sm:$0xff] }
  0x79   :  { %2595 = vmatpush1.bf16.msra.mxu1 %v3542_v13  ;;  %264 = vmatprep.mubr.f32.mxu0 %v3417_v0  ;;  %v3608_v25 = vpack.c.bf16 %v508_v17, %v504_v15  ;;  %v3612_v27 = vpack.c.bf16 %v510_v21, %v506_v20  ;;  %v160_v33 = vld [vmem:[#allocation11] sm:$0xf] }
  0x7a   :  { %377 = vmatprep.mubr.f32.mxu1 %v3417_v0  ;;  %2565 = vmatprep.subr.bf16.mxu0 %v3546_v16  ;;  %v3661_v37 = vrot.slane %v160_v33, %v168_v34  ;;  %v3668_v59 = vrot.slane %v160_v33, %v172_v55 }
  0x7b   :  { %265 = vmatmul.mubr.f32.gmra.mrb[6].mxu0 %v91_v22  ;;  %2597 = vmatprep.subr.bf16.mxu1 %v3549_v19 }
  0x7c   :  { %378 = vmatmul.mubr.f32.gmra.mrb[6].mxu1 %v91_v22  ;;  %2567 = vmatpush1.bf16.msra.mxu0 %v3552_v23  ;;  %v3605_v22 = vpack.c.bf16 %v511_v12, %v507_v11 }
  0x7d   :  { %2599 = vmatpush1.bf16.msra.mxu1 %v3556_v26  ;;  %270 = vmatprep.mubr.f32.mxu0 %v3417_v0 }
  0x7e   :  { %383 = vmatprep.mubr.f32.mxu1 %v3417_v0  ;;  %2569 = vmatprep.subr.bf16.mxu0 %v3560_v29 }
  0x7f   :  { %271 = vmatmul.mubr.f32.gmra.mrb[8].mxu0 %v92_v35  ;;  %2601 = vmatprep.subr.bf16.mxu1 %v3563_v32 }
  0x80   :  { %384 = vmatmul.mubr.f32.gmra.mrb[8].mxu1 %v92_v35  ;;  %2571 = vmatpush1.bf16.msra.mxu0 %v3566_v36  ;;  %v3659_v35 = vrot.slane %v160_v33, %v164_v31 }
  0x81   :  { %2603 = vmatpush1.bf16.msra.mxu1 %v3570_v40  ;;  %276 = vmatprep.mubr.f32.mxu0 %v3417_v0 }
  0x82   :  { %389 = vmatprep.mubr.f32.mxu1 %v3417_v0  ;;  %2573 = vmatprep.subr.bf16.mxu0 %v3574_v44 }
  0x83   :  { %277 = vmatmul.mubr.f32.gmra.mrb[10].mxu0 %v93_v52  ;;  %2605 = vmatprep.subr.bf16.mxu1 %v3577_v48 }
  0x84   :  { %390 = vmatmul.mubr.f32.gmra.mrb[10].mxu1 %v93_v52  ;;  %2575 = vmatpush1.bf16.msra.mxu0 %v3580_v54  ;;  %v3665_v52 = vrot.slane %v160_v33, %v176_v42 }
  0x85   :  { %2607 = vmatpush1.bf16.msra.mxu1 %v3584_v58  ;;  %282 = vmatprep.mubr.f32.mxu0 %v3417_v0 }
  0x86   :  { %395 = vmatprep.mubr.f32.mxu1 %v3417_v0  ;;  %2577 = vmatprep.subr.bf16.mxu0 %v3588_v62 }
  0x87   :  { %283 = vmatmul.mubr.f32.gmra.mrb[12].mxu0 %v94_v8  ;;  %2609 = vmatprep.subr.bf16.mxu1 %v3591_v4 }
  0x88   :  { %396 = vmatmul.mubr.f32.gmra.mrb[12].mxu1 %v94_v8  ;;  %2579 = vmatpush1.bf16.msra.mxu0 %v3594_v9 }
  0x89   :  { %2611 = vmatpush1.bf16.msra.mxu1 %v3598_v14  ;;  %288 = vmatprep.mubr.f32.mxu0 %v3417_v0 }
  0x8a   :  { %401 = vmatprep.mubr.f32.mxu1 %v3417_v0  ;;  %2581 = vmatprep.subr.bf16.mxu0 %v3602_v18 }
  0x8b   :  { %289 = vmatmul.mubr.f32.gmra.mrb[14].mxu0 %v95_v24  ;;  %2613 = vmatprep.subr.bf16.mxu1 %v3605_v22 }
  0x8c   :  { %402 = vmatmul.mubr.f32.gmra.mrb[14].mxu1 %v95_v24  ;;  %2583 = vmatpush1.bf16.msra.mxu0 %v3608_v25 }
  0x8d   :  { %2615 = vmatpush1.bf16.msra.mxu1 %v3612_v27  ;;  %576 = vmatprep.mubr.f32.mxu0 %v3417_v0 }
  0x8e   :  { %647 = vmatprep.mubr.f32.mxu1 %v3417_v0  ;;  %2617 = vmatprep.subr.bf16.mxu0 %v3509_v38 }
  0x8f   :  { %577 = vmatmul.mubr.f32.vlgmr.msra.gmra.mrb[0].mxu0 %v3417_v0  ;;  %2649 = vmatprep.subr.bf16.mxu1 %v3511_v41 }
  0x90   :  { %648 = vmatmul.mubr.f32.vlgmr.msra.gmra.mrb[0].mxu1 %v3417_v0  ;;  %2619 = vmatpush1.bf16.msra.mxu0 %v3513_v47 }
  0x91   :  { %2651 = vmatpush1.bf16.msra.mxu1 %v3516_v50  ;;  %2621 = vmatprep.subr.bf16.mxu0 %v3519_v53 }
  0x92   :  { %2653 = vmatprep.subr.bf16.mxu1 %v3521_v56  ;;  %822 = vmatprep.mubr.f32.mxu0 %v3417_v0 }
  0x93   :  { %893 = vmatprep.mubr.f32.mxu1 %v3417_v0 }
  0x94   :  { %2623 = vmatpush1.bf16.msra.mxu0 %v3524_v60 }
  0x95   :  { %2655 = vmatpush1.bf16.msra.mxu1 %v3528_v63  ;;  %2625 = vmatprep.subr.bf16.mxu0 %v3532_v3 }
  0x96   :  { %2657 = vmatprep.subr.bf16.mxu1 %v3535_v6 }
  0x98   :  { %2627 = vmatpush1.bf16.msra.mxu0 %v3538_v10 }
  0x99   :  { %2659 = vmatpush1.bf16.msra.mxu1 %v3542_v13  ;;  %2629 = vmatprep.subr.bf16.mxu0 %v3546_v16 }
  0x9a   :  { %2661 = vmatprep.subr.bf16.mxu1 %v3549_v19 }
  0x9c   :  { %2631 = vmatpush1.bf16.msra.mxu0 %v3552_v23 }
  0x9d   :  { %2663 = vmatpush1.bf16.msra.mxu1 %v3556_v26  ;;  %2633 = vmatprep.subr.bf16.mxu0 %v3560_v29 }
  0x9e   :  { %2665 = vmatprep.subr.bf16.mxu1 %v3563_v32 }
  0xa0   :  { %2635 = vmatpush1.bf16.msra.mxu0 %v3566_v36 }
  0xa1   :  { %2667 = vmatpush1.bf16.msra.mxu1 %v3570_v40  ;;  %2637 = vmatprep.subr.bf16.mxu0 %v3574_v44 }
  0xa2   :  { %2669 = vmatprep.subr.bf16.mxu1 %v3577_v48 }
  0xa4   :  { %2639 = vmatpush1.bf16.msra.mxu0 %v3580_v54 }
  0xa5   :  { %2671 = vmatpush1.bf16.msra.mxu1 %v3584_v58  ;;  %2641 = vmatprep.subr.bf16.mxu0 %v3588_v62 }
  0xa6   :  { %2673 = vmatprep.subr.bf16.mxu1 %v3591_v4 }
  0xa8   :  { %2643 = vmatpush1.bf16.msra.mxu0 %v3594_v9 }
  0xa9   :  { %2675 = vmatpush1.bf16.msra.mxu1 %v3598_v14  ;;  %2645 = vmatprep.subr.bf16.mxu0 %v3602_v18 }
  0xaa   :  { %2677 = vmatprep.subr.bf16.mxu1 %v3605_v22 }
  0xac   :  { %2647 = vmatpush1.bf16.msra.mxu0 %v3608_v25 }
  0xad   :  { %2679 = vmatpush1.bf16.msra.mxu1 %v3612_v27  ;;  %2681 = vmatprep.subr.bf16.mxu0 %v3509_v38 }
  0xae   :  { %2713 = vmatprep.subr.bf16.mxu1 %v3511_v41 }
 0x162   :  { %v578_v39 = vpop.f32.mrb[0].mxu0 }
 0x163   :  { %v3064_v43 = vadd.f32 %v578_v39, %v3659_v35  ;;  %v649_v45 = vpop.f32.mrb[0].mxu1  ;;  %v580_v46 = vpop.f32.mrb[1].mxu0 }
 0x164   :  { %v3065_v49 = vadd.f32 %v580_v46, %v3661_v37  ;;  %v651_v38 = vpop.f32.mrb[1].mxu1  ;;  %v3080_v1 = vadd.f32 %v649_v45, %v3668_v59 }
 0x165   :  { %v2464_v51 = vmul.f32 -1.442695, %v3064_v43  ;;  %v3081_v57 = vadd.f32 %v651_v38, %v3665_v52 }
 0x166   :  { %v2465_v41 = vmul.f32 -1.442695, %v3065_v49 }
 0x167   :  { %3139 = vpow2.f32 %v2464_v51  ;;  %v2466_v61 = vmul.f32 -1.442695, %v3081_v57 }
 0x168   :  { %3141 = vpow2.f32 %v2465_v41 }
 0x169   :  { %3143 = vpow2.f32 %v2466_v61 }
 0x16a   :  { %3145 = vtanh.f32 %v3080_v1 }
 0x171   :  { %v3140_v2 = vpop.eup %3139 }
 0x172   :  { %v3142_v5 = vpop.eup %3141  ;;  %v661_v7 = vadd.f32 1.0, %v3140_v2 }
 0x173   :  { %v667_v8 = vadd.f32 1.0, %v3142_v5  ;;  %v3144_v11 = vpop.eup %3143 }
 0x174   :  { %3147 = vrcp.f32 %v661_v7  ;;  %v3146_v12 = vpop.eup %3145  ;;  %v674_v21 = vadd.f32 1.0, %v3144_v11 }
 0x175   :  { %3149 = vrcp.f32 %v667_v8 }
 0x176   :  { %3151 = vrcp.f32 %v674_v21 }
 0x17e   :  { %v3148_v15 = vpop.eup %3147 }
 0x17f   :  { %v3150_v17 = vpop.eup %3149  ;;  %v679_v20 = vmul.f32 %v3148_v15, %v3146_v12  ;;  %v1189_v15 = vld [vmem:[#allocation10 + $0x8] sm:$0xff] }
 0x180   :  { %v678_v24 = vmul.f32 0.0, %v3150_v17  ;;  %v3152_v30 = vpop.eup %3151  ;;  %v1193_v17 = vld [vmem:[#allocation10 + $0x28] sm:$0xff] }
 0x181   :  { %v3716_v21 = vpack.c.bf16 %v1193_v17, %v1189_v15  ;;  %v1453_v15 = vld [vmem:[#allocation10 + $0x90] sm:$0xff] }
 0x182   :  { %v3671_v28 = vadd.f32 %v679_v20, %v678_v24  ;;  %v1191_v20 = vld [vmem:[#allocation10 + $0x18] sm:$0xff]  ;;  %v1457_v17 = vld [vmem:[#allocation10 + $0xb0] sm:$0xff] }
 0x183   :  { %v1195_v24 = vld [vmem:[#allocation10 + $0x38] sm:$0xff] }
 0x184   :  { %3153 = vtanh.f32 %v3671_v28 }
 0x18e   :  { %v3154_v31 = vpop.eup %3153 }
 0x18f   :  { %v682_v33 = vmul.f32 %v3154_v31, %v3152_v30  ;;  %v1192_v30 = vld [vmem:[#allocation10 + $0x20] sm:$0xff]  ;;  %v3718_v31 = vpack.c.bf16 %v1195_v24, %v1191_v20  ;;  %v3789_v20 = vpack.c.bf16 %v1457_v17, %v1453_v15  ;;  %v1460_v24 = vld [vmem:[#allocation10 + $0xc8] sm:$0xff]  ;;  %v1485_v15 = vld [vmem:[#allocation10 + $0x190] sm:$0xff] }
 0x191   :  { %685 = vst [vmem:[#allocation13] sm:$0xff] %v682_v33  ;;  %823 = vmatmul.mubr.f32.vlgmr.msra.gmra.mrb[2].mxu0 %v682_v33  ;;  %894 = vmatmul.mubr.f32.vlgmr.msra.gmra.mrb[2].mxu1 %v682_v33 }
 0x192   :  { %2683 = vmatpush1.bf16.msra.mxu0 %v3513_v47  ;;  %2715 = vmatpush1.bf16.msra.mxu1 %v3516_v50 }
 0x193   :  { %2685 = vmatprep.subr.bf16.mxu0 %v3519_v53  ;;  %2717 = vmatprep.subr.bf16.mxu1 %v3521_v56 }
 0x194   :  { %1069 = vmatprep.mubr.f32.mxu0 %v3417_v0  ;;  %1140 = vmatprep.mubr.f32.mxu1 %v3417_v0 }
 0x196   :  { %2687 = vmatpush1.bf16.msra.mxu0 %v3524_v60  ;;  %2719 = vmatpush1.bf16.msra.mxu1 %v3528_v63 }
 0x197   :  { %2689 = vmatprep.subr.bf16.mxu0 %v3532_v3  ;;  %2721 = vmatprep.subr.bf16.mxu1 %v3535_v6 }
 0x19a   :  { %2691 = vmatpush1.bf16.msra.mxu0 %v3538_v10  ;;  %2723 = vmatpush1.bf16.msra.mxu1 %v3542_v13 }
 0x19b   :  { %2693 = vmatprep.subr.bf16.mxu0 %v3546_v16  ;;  %2725 = vmatprep.subr.bf16.mxu1 %v3549_v19 }
 0x19e   :  { %2695 = vmatpush1.bf16.msra.mxu0 %v3552_v23  ;;  %2727 = vmatpush1.bf16.msra.mxu1 %v3556_v26 }
 0x19f   :  { %2697 = vmatprep.subr.bf16.mxu0 %v3560_v29  ;;  %2729 = vmatprep.subr.bf16.mxu1 %v3563_v32 }
 0x1a2   :  { %2699 = vmatpush1.bf16.msra.mxu0 %v3566_v36  ;;  %2731 = vmatpush1.bf16.msra.mxu1 %v3570_v40 }
 0x1a3   :  { %2701 = vmatprep.subr.bf16.mxu0 %v3574_v44  ;;  %2733 = vmatprep.subr.bf16.mxu1 %v3577_v48 }
 0x1a6   :  { %2703 = vmatpush1.bf16.msra.mxu0 %v3580_v54  ;;  %2735 = vmatpush1.bf16.msra.mxu1 %v3584_v58 }
 0x1a7   :  { %2705 = vmatprep.subr.bf16.mxu0 %v3588_v62  ;;  %2737 = vmatprep.subr.bf16.mxu1 %v3591_v4 }
 0x1aa   :  { %2707 = vmatpush1.bf16.msra.mxu0 %v3594_v9  ;;  %2739 = vmatpush1.bf16.msra.mxu1 %v3598_v14 }
 0x1ab   :  { %2709 = vmatprep.subr.bf16.mxu0 %v3602_v18  ;;  %2741 = vmatprep.subr.bf16.mxu1 %v3605_v22 }
 0x1ae   :  { %2711 = vmatpush1.bf16.msra.mxu0 %v3608_v25  ;;  %2743 = vmatpush1.bf16.msra.mxu1 %v3612_v27 }
 0x1af   :  { %2745 = vmatprep.subr.bf16.mxu0 %v3716_v21  ;;  %2777 = vmatprep.subr.bf16.mxu1 %v3718_v31 }
 0x264   :  { %v824_v47 = vpop.f32.mrb[2].mxu0  ;;  %v895_v50 = vpop.f32.mrb[2].mxu1 }
 0x265   :  { %v3066_v53 = vadd.f32 %v824_v47, %v3659_v35  ;;  %v826_v56 = vpop.f32.mrb[3].mxu0  ;;  %v897_v60 = vpop.f32.mrb[3].mxu1  ;;  %v3082_v45 = vadd.f32 %v895_v50, %v3668_v59  ;;  %v1190_v47 = vld [vmem:[#allocation10 + $0x10] sm:$0xff] }
 0x266   :  { %v3067_v63 = vadd.f32 %v826_v56, %v3661_v37  ;;  %v3083_v42 = vadd.f32 %v897_v60, %v3665_v52  ;;  %v1194_v50 = vld [vmem:[#allocation10 + $0x30] sm:$0xff]  ;;  %v1197_v56 = vld [vmem:[#allocation10 + $0x48] sm:$0xff] }
 0x267   :  { %v2467_v34 = vmul.f32 -1.442695, %v3066_v53  ;;  %v3723_v53 = vpack.c.bf16 %v1194_v50, %v1190_v47  ;;  %v1201_v60 = vld [vmem:[#allocation10 + $0x68] sm:$0xff]  ;;  %v1466_v50 = vld [vmem:[#allocation10 + $0xf8] sm:$0xff] }
 0x268   :  { %v2468_v39 = vmul.f32 -1.442695, %v3067_v63  ;;  %v2469_v43 = vmul.f32 -1.442695, %v3083_v42  ;;  %v1199_v63 = vld [vmem:[#allocation10 + $0x58] sm:$0xff]  ;;  %v1196_v42 = vld [vmem:[#allocation10 + $0x40] sm:$0xff] }
 0x269   :  { %3155 = vpow2.f32 %v2467_v34  ;;  %v3728_v34 = vpack.c.bf16 %v1201_v60, %v1197_v56  ;;  %v1459_v56 = vld [vmem:[#allocation10 + $0xc0] sm:$0xff] }
 0x26a   :  { %3157 = vpow2.f32 %v2468_v39  ;;  %v1203_v39 = vld [vmem:[#allocation10 + $0x78] sm:$0xff]  ;;  %v1463_v60 = vld [vmem:[#allocation10 + $0xe0] sm:$0xff] }
 0x26b   :  { %3159 = vpow2.f32 %v2469_v43  ;;  %v1200_v43 = vld [vmem:[#allocation10 + $0x60] sm:$0xff] }
 0x26c   :  { %3161 = vtanh.f32 %v3082_v45  ;;  %v3730_v45 = vpack.c.bf16 %v1203_v39, %v1199_v63  ;;  %v3798_v39 = vpack.c.bf16 %v1463_v60, %v1459_v56  ;;  %v1494_v60 = vld [vmem:[#allocation10 + $0x1d8] sm:$0xff] }
 0x273   :  { %v3156_v46 = vpop.eup %3155 }
 0x274   :  { %v3158_v49 = vpop.eup %3157  ;;  %v907_v38 = vadd.f32 1.0, %v3156_v46  ;;  %v3732_v46 = vpack.c.bf16 %v1200_v43, %v1196_v42  ;;  %v1461_v42 = vld [vmem:[#allocation10 + $0xd0] sm:$0xff] }
 0x275   :  { %v913_v51 = vadd.f32 1.0, %v3158_v49  ;;  %v3160_v41 = vpop.eup %3159  ;;  %v1198_v49 = vld [vmem:[#allocation10 + $0x50] sm:$0xff] }
 0x276   :  { %3163 = vrcp.f32 %v907_v38  ;;  %v3162_v55 = vpop.eup %3161  ;;  %v920_v2 = vadd.f32 1.0, %v3160_v41  ;;  %v1202_v38 = vld [vmem:[#allocation10 + $0x70] sm:$0xff] }
 0x277   :  { %3165 = vrcp.f32 %v913_v51  ;;  %v3735_v51 = vpack.c.bf16 %v1202_v38, %v1198_v49  ;;  %v1465_v43 = vld [vmem:[#allocation10 + $0xf0] sm:$0xff]  ;;  %v1468_v38 = vld [vmem:[#allocation10 + $0x108] sm:$0xff] }
 0x278   :  { %3167 = vrcp.f32 %v920_v2  ;;  %v3801_v49 = vpack.c.bf16 %v1465_v43, %v1461_v42  ;;  %v1498_v42 = vld [vmem:[#allocation10 + $0x1f8] sm:$0xff]  ;;  %v1491_v43 = vld [vmem:[#allocation10 + $0x1c0] sm:$0xff] }
 0x280   :  { %v3164_v57 = vpop.eup %3163 }
 0x281   :  { %v3166_v61 = vpop.eup %3165  ;;  %v925_v1 = vmul.f32 %v3164_v57, %v3162_v55  ;;  %v1452_v57 = vld [vmem:[#allocation10 + $0x88] sm:$0xff] }
 0x282   :  { %v924_v5 = vmul.f32 %v3166_v61, %v3671_v28  ;;  %v3168_v8 = vpop.eup %3167  ;;  %v1188_v28 = vld [vmem:[#allocation10] sm:$0xff]  ;;  %v1456_v61 = vld [vmem:[#allocation10 + $0xa8] sm:$0xff] }
 0x283   :  { %v3720_v33 = vpack.c.bf16 %v1192_v30, %v1188_v28  ;;  %v3782_v2 = vpack.c.bf16 %v1456_v61, %v1452_v57  ;;  %v1464_v28 = vld [vmem:[#allocation10 + $0xe8] sm:$0xff]  ;;  %v1462_v30 = vld [vmem:[#allocation10 + $0xd8] sm:$0xff] }
 0x284   :  { %v3711_v7 = vadd.f32 %v925_v1, %v924_v5  ;;  %v1454_v1 = vld [vmem:[#allocation10 + $0x98] sm:$0xff]  ;;  %v3794_v47 = vpack.c.bf16 %v1464_v28, %v1460_v24  ;;  %v3796_v63 = vpack.c.bf16 %v1466_v50, %v1462_v30  ;;  %v1489_v24 = vld [vmem:[#allocation10 + $0x1b0] sm:$0xff]  ;;  %v1492_v28 = vld [vmem:[#allocation10 + $0x1c8] sm:$0xff] }
 0x285   :  { %v1458_v5 = vld [vmem:[#allocation10 + $0xb8] sm:$0xff]  ;;  %v1496_v30 = vld [vmem:[#allocation10 + $0x1e8] sm:$0xff]  ;;  %v3837_v50 = vpack.c.bf16 %v1489_v24, %v1485_v15 }
 0x286   :  { %3169 = vtanh.f32 %v3711_v7  ;;  %v1486_v57 = vld [vmem:[#allocation10 + $0x198] sm:$0xff]  ;;  %v3839_v56 = vpack.c.bf16 %v1496_v30, %v1492_v28 }
 0x287   :  { %v1490_v61 = vld [vmem:[#allocation10 + $0x1b8] sm:$0xff] }
 0x290   :  { %v3170_v11 = vpop.eup %3169 }
 0x291   :  { %v928_v12 = vmul.f32 %v3170_v11, %v3168_v8  ;;  %v1455_v8 = vld [vmem:[#allocation10 + $0xa0] sm:$0xff]  ;;  %v3784_v11 = vpack.c.bf16 %v1458_v5, %v1454_v1  ;;  %v3830_v5 = vpack.c.bf16 %v1490_v61, %v1486_v57 }
 0x293   :  { %932 = vst [vmem:[#allocation13 + $0x8] sm:$0xff] %v928_v12  ;;  %1070 = vmatmul.mubr.f32.vlgmr.msra.gmra.mrb[4].mxu0 %v928_v12  ;;  %1141 = vmatmul.mubr.f32.vlgmr.msra.gmra.mrb[4].mxu1 %v928_v12 }
 0x294   :  { %1316 = vmatprep.mubr.f32.mxu0 %v3417_v0  ;;  %1387 = vmatprep.mubr.f32.mxu1 %v3417_v0 }
 0x295   :  { %2747 = vmatpush1.bf16.msra.mxu0 %v3720_v33  ;;  %2779 = vmatpush1.bf16.msra.mxu1 %v3723_v53 }
 0x296   :  { %2749 = vmatprep.subr.bf16.mxu0 %v3728_v34  ;;  %2781 = vmatprep.subr.bf16.mxu1 %v3730_v45 }
 0x299   :  { %2751 = vmatpush1.bf16.msra.mxu0 %v3732_v46  ;;  %2783 = vmatpush1.bf16.msra.mxu1 %v3735_v51 }
 0x29a   :  { %2753 = vmatprep.subr.bf16.mxu0 %v3532_v3  ;;  %2785 = vmatprep.subr.bf16.mxu1 %v3535_v6 }
 0x29d   :  { %2755 = vmatpush1.bf16.msra.mxu0 %v3538_v10  ;;  %2787 = vmatpush1.bf16.msra.mxu1 %v3542_v13 }
 0x29e   :  { %2757 = vmatprep.subr.bf16.mxu0 %v3546_v16  ;;  %2789 = vmatprep.subr.bf16.mxu1 %v3549_v19 }
 0x2a1   :  { %2759 = vmatpush1.bf16.msra.mxu0 %v3552_v23  ;;  %2791 = vmatpush1.bf16.msra.mxu1 %v3556_v26 }
 0x2a2   :  { %2761 = vmatprep.subr.bf16.mxu0 %v3560_v29  ;;  %2793 = vmatprep.subr.bf16.mxu1 %v3563_v32 }
 0x2a5   :  { %2763 = vmatpush1.bf16.msra.mxu0 %v3566_v36  ;;  %2795 = vmatpush1.bf16.msra.mxu1 %v3570_v40 }
 0x2a6   :  { %2765 = vmatprep.subr.bf16.mxu0 %v3574_v44  ;;  %2797 = vmatprep.subr.bf16.mxu1 %v3577_v48 }
 0x2a9   :  { %2767 = vmatpush1.bf16.msra.mxu0 %v3580_v54  ;;  %2799 = vmatpush1.bf16.msra.mxu1 %v3584_v58 }
 0x2aa   :  { %2769 = vmatprep.subr.bf16.mxu0 %v3588_v62  ;;  %2801 = vmatprep.subr.bf16.mxu1 %v3591_v4 }
 0x2ad   :  { %2771 = vmatpush1.bf16.msra.mxu0 %v3594_v9  ;;  %2803 = vmatpush1.bf16.msra.mxu1 %v3598_v14 }
 0x2ae   :  { %2773 = vmatprep.subr.bf16.mxu0 %v3602_v18  ;;  %2805 = vmatprep.subr.bf16.mxu1 %v3605_v22 }
 0x2b1   :  { %2775 = vmatpush1.bf16.msra.mxu0 %v3608_v25  ;;  %2807 = vmatpush1.bf16.msra.mxu1 %v3612_v27 }
 0x2b2   :  { %2809 = vmatprep.subr.bf16.mxu0 %v3716_v21  ;;  %2841 = vmatprep.subr.bf16.mxu1 %v3718_v31 }
 0x366   :  { %v1071_v3 = vpop.f32.mrb[4].mxu0  ;;  %v1142_v6 = vpop.f32.mrb[4].mxu1 }
 0x367   :  { %v3068_v10 = vadd.f32 %v1071_v3, %v3659_v35  ;;  %v1073_v13 = vpop.f32.mrb[5].mxu0  ;;  %v1144_v16 = vpop.f32.mrb[5].mxu1  ;;  %v3084_v36 = vadd.f32 %v1142_v6, %v3668_v59  ;;  %v1472_v3 = vld [vmem:[#allocation10 + $0x128] sm:$0xff]  ;;  %v1470_v6 = vld [vmem:[#allocation10 + $0x118] sm:$0xff] }
 0x368   :  { %v3069_v19 = vadd.f32 %v1073_v13, %v3661_v37  ;;  %v3085_v29 = vadd.f32 %v1144_v16, %v3665_v52  ;;  %v1474_v13 = vld [vmem:[#allocation10 + $0x138] sm:$0xff]  ;;  %v1467_v16 = vld [vmem:[#allocation10 + $0x100] sm:$0xff] }
 0x369   :  { %v2470_v23 = vmul.f32 -1.442695, %v3068_v10  ;;  %v3806_v10 = vpack.c.bf16 %v1472_v3, %v1468_v38  ;;  %v3842_v38 = vpack.c.bf16 %v1498_v42, %v1494_v60  ;;  %v1495_v3 = vld [vmem:[#allocation10 + $0x1e0] sm:$0xff] }
 0x36a   :  { %v2471_v26 = vmul.f32 -1.442695, %v3069_v19  ;;  %v2472_v32 = vmul.f32 -1.442695, %v3085_v29  ;;  %v1471_v19 = vld [vmem:[#allocation10 + $0x120] sm:$0xff]  ;;  %v1469_v29 = vld [vmem:[#allocation10 + $0x110] sm:$0xff] }
 0x36b   :  { %3171 = vpow2.f32 %v2470_v23  ;;  %v3808_v23 = vpack.c.bf16 %v1474_v13, %v1470_v6  ;;  %v1493_v6 = vld [vmem:[#allocation10 + $0x1d0] sm:$0xff] }
 0x36c   :  { %3173 = vpow2.f32 %v2471_v26  ;;  %v3810_v26 = vpack.c.bf16 %v1471_v19, %v1467_v16  ;;  %v1497_v13 = vld [vmem:[#allocation10 + $0x1f0] sm:$0xff]  ;;  %v3845_v16 = vpack.c.bf16 %v1495_v3, %v1491_v43 }
 0x36d   :  { %3175 = vpow2.f32 %v2472_v32  ;;  %v1473_v32 = vld [vmem:[#allocation10 + $0x130] sm:$0xff]  ;;  %v3849_v19 = vpack.c.bf16 %v1497_v13, %v1493_v6 }
 0x36e   :  { %3177 = vtanh.f32 %v3084_v36  ;;  %v3813_v36 = vpack.c.bf16 %v1473_v32, %v1469_v29 }
 0x375   :  { %v3172_v40 = vpop.eup %3171 }
 0x376   :  { %v3174_v44 = vpop.eup %3173  ;;  %v1154_v48 = vadd.f32 1.0, %v3172_v40  ;;  %v1476_v40 = vld [vmem:[#allocation10 + $0x148] sm:$0xff] }
 0x377   :  { %v1160_v54 = vadd.f32 1.0, %v3174_v44  ;;  %v3176_v58 = vpop.eup %3175  ;;  %v1480_v44 = vld [vmem:[#allocation10 + $0x168] sm:$0xff] }
 0x378   :  { %3179 = vrcp.f32 %v1154_v48  ;;  %v3178_v62 = vpop.eup %3177  ;;  %v1167_v18 = vadd.f32 1.0, %v3176_v58  ;;  %v1478_v48 = vld [vmem:[#allocation10 + $0x158] sm:$0xff] }
 0x379   :  { %3181 = vrcp.f32 %v1160_v54  ;;  %v3817_v54 = vpack.c.bf16 %v1480_v44, %v1476_v40  ;;  %v1482_v58 = vld [vmem:[#allocation10 + $0x178] sm:$0xff] }
 0x37a   :  { %3183 = vrcp.f32 %v1167_v18  ;;  %v1477_v18 = vld [vmem:[#allocation10 + $0x150] sm:$0xff] }
 0x382   :  { %v3180_v4 = vpop.eup %3179 }
 0x383   :  { %v3182_v9 = vpop.eup %3181  ;;  %v1172_v14 = vmul.f32 %v3180_v4, %v3178_v62  ;;  %v1475_v62 = vld [vmem:[#allocation10 + $0x140] sm:$0xff] }
 0x384   :  { %v1171_v22 = vmul.f32 %v3182_v9, %v3711_v7  ;;  %v3184_v27 = vpop.eup %3183  ;;  %v1451_v7 = vld [vmem:[#allocation10 + $0x80] sm:$0xff]  ;;  %v3820_v9 = vpack.c.bf16 %v1482_v58, %v1478_v48 }
 0x385   :  { %v3786_v12 = vpack.c.bf16 %v1455_v8, %v1451_v7  ;;  %v1479_v4 = vld [vmem:[#allocation10 + $0x160] sm:$0xff] }
 0x386   :  { %v3771_v25 = vadd.f32 %v1172_v14, %v1171_v22  ;;  %v3822_v14 = vpack.c.bf16 %v1479_v4, %v1475_v62  ;;  %v1481_v22 = vld [vmem:[#allocation10 + $0x170] sm:$0xff]  ;;  %v1483_v7 = vld [vmem:[#allocation10 + $0x180] sm:$0xff] }
 0x387   :  { %v1487_v8 = vld [vmem:[#allocation10 + $0x1a0] sm:$0xff] }
 0x388   :  { %3185 = vtanh.f32 %v3771_v25  ;;  %v3833_v17 = vpack.c.bf16 %v1487_v8, %v1483_v7 }
 0x392   :  { %v3186_v41 = vpop.eup %3185 }
 0x393   :  { %v1175_v55 = vmul.f32 %v3186_v41, %v3184_v27  ;;  %v1484_v27 = vld [vmem:[#allocation10 + $0x188] sm:$0xff]  ;;  %v3825_v41 = vpack.c.bf16 %v1481_v22, %v1477_v18 }
 0x395   :  { %1179 = vst [vmem:[#allocation13 + $0x10] sm:$0xff] %v1175_v55  ;;  %1317 = vmatmul.mubr.f32.vlgmr.msra.gmra.mrb[6].mxu0 %v1175_v55  ;;  %1388 = vmatmul.mubr.f32.vlgmr.msra.gmra.mrb[6].mxu1 %v1175_v55  ;;  %v1488_v55 = vld [vmem:[#allocation10 + $0x1a8] sm:$0xff] }
 0x396   :  { %2811 = vmatpush1.bf16.msra.mxu0 %v3720_v33  ;;  %2843 = vmatpush1.bf16.msra.mxu1 %v3723_v53  ;;  %v3828_v1 = vpack.c.bf16 %v1488_v55, %v1484_v27 }
 0x397   :  { %2813 = vmatprep.subr.bf16.mxu0 %v3728_v34  ;;  %2845 = vmatprep.subr.bf16.mxu1 %v3730_v45 }
 0x398   :  { %1563 = vmatprep.mubr.f32.mxu0 %v3417_v0  ;;  %1634 = vmatprep.mubr.f32.mxu1 %v3417_v0 }
 0x39a   :  { %2815 = vmatpush1.bf16.msra.mxu0 %v3732_v46  ;;  %2847 = vmatpush1.bf16.msra.mxu1 %v3735_v51 }
 0x39b   :  { %2817 = vmatprep.subr.bf16.mxu0 %v3782_v2  ;;  %2849 = vmatprep.subr.bf16.mxu1 %v3784_v11 }
 0x39e   :  { %2819 = vmatpush1.bf16.msra.mxu0 %v3786_v12  ;;  %2851 = vmatpush1.bf16.msra.mxu1 %v3789_v20 }
 0x39f   :  { %2821 = vmatprep.subr.bf16.mxu0 %v3794_v47  ;;  %2853 = vmatprep.subr.bf16.mxu1 %v3796_v63 }
 0x3a2   :  { %2823 = vmatpush1.bf16.msra.mxu0 %v3798_v39  ;;  %2855 = vmatpush1.bf16.msra.mxu1 %v3801_v49 }
 0x3a3   :  { %2825 = vmatprep.subr.bf16.mxu0 %v3806_v10  ;;  %2857 = vmatprep.subr.bf16.mxu1 %v3808_v23 }
 0x3a6   :  { %2827 = vmatpush1.bf16.msra.mxu0 %v3810_v26  ;;  %2859 = vmatpush1.bf16.msra.mxu1 %v3813_v36 }
 0x3a7   :  { %2829 = vmatprep.subr.bf16.mxu0 %v3817_v54  ;;  %2861 = vmatprep.subr.bf16.mxu1 %v3820_v9 }
 0x3aa   :  { %2831 = vmatpush1.bf16.msra.mxu0 %v3822_v14  ;;  %2863 = vmatpush1.bf16.msra.mxu1 %v3825_v41 }
 0x3ab   :  { %2833 = vmatprep.subr.bf16.mxu0 %v3828_v1  ;;  %2865 = vmatprep.subr.bf16.mxu1 %v3830_v5 }
 0x3ae   :  { %2835 = vmatpush1.bf16.msra.mxu0 %v3833_v17  ;;  %2867 = vmatpush1.bf16.msra.mxu1 %v3837_v50 }
 0x3af   :  { %2837 = vmatprep.subr.bf16.mxu0 %v3839_v56  ;;  %2869 = vmatprep.subr.bf16.mxu1 %v3842_v38 }
 0x3b2   :  { %2839 = vmatpush1.bf16.msra.mxu0 %v3845_v16  ;;  %2871 = vmatpush1.bf16.msra.mxu1 %v3849_v19 }
 0x3b3   :  { %2873 = vmatprep.subr.bf16.mxu0 %v3716_v21  ;;  %2905 = vmatprep.subr.bf16.mxu1 %v3718_v31 }
 0x468   :  { %v1318_v29 = vpop.f32.mrb[6].mxu0  ;;  %v1389_v32 = vpop.f32.mrb[6].mxu1 }
 0x469   :  { %v3070_v40 = vadd.f32 %v1318_v29, %v3659_v35  ;;  %v1320_v44 = vpop.f32.mrb[7].mxu0  ;;  %v1391_v48 = vpop.f32.mrb[7].mxu1  ;;  %v3086_v27 = vadd.f32 %v1389_v32, %v3668_v59 }
 0x46a   :  { %v3071_v58 = vadd.f32 %v1320_v44, %v3661_v37  ;;  %v3087_v18 = vadd.f32 %v1391_v48, %v3665_v52 }
 0x46b   :  { %v2473_v62 = vmul.f32 -1.442695, %v3070_v40 }
 0x46c   :  { %v2474_v4 = vmul.f32 -1.442695, %v3071_v58  ;;  %v2475_v22 = vmul.f32 -1.442695, %v3087_v18 }
 0x46d   :  { %3187 = vpow2.f32 %v2473_v62 }
 0x46e   :  { %3189 = vpow2.f32 %v2474_v4 }
 0x46f   :  { %3191 = vpow2.f32 %v2475_v22 }
 0x470   :  { %3193 = vtanh.f32 %v3086_v27 }
 0x477   :  { %v3188_v55 = vpop.eup %3187 }
 0x478   :  { %v3190_v57 = vpop.eup %3189  ;;  %v1401_v61 = vadd.f32 1.0, %v3188_v55 }
 0x479   :  { %v1407_v7 = vadd.f32 1.0, %v3190_v57  ;;  %v3192_v8 = vpop.eup %3191 }
 0x47a   :  { %3195 = vrcp.f32 %v1401_v61  ;;  %v3194_v15 = vpop.eup %3193  ;;  %v1414_v60 = vadd.f32 1.0, %v3192_v8 }
 0x47b   :  { %3197 = vrcp.f32 %v1407_v7 }
 0x47c   :  { %3199 = vrcp.f32 %v1414_v60 }
 0x484   :  { %v3196_v24 = vpop.eup %3195 }
 0x485   :  { %v3198_v28 = vpop.eup %3197  ;;  %v1419_v30 = vmul.f32 %v3196_v24, %v3194_v15 }
 0x486   :  { %v1418_v42 = vmul.f32 %v3198_v28, %v3771_v25  ;;  %v3200_v3 = vpop.eup %3199 }
 0x488   :  { %v3861_v43 = vadd.f32 %v1419_v30, %v1418_v42 }
 0x48a   :  { %3201 = vtanh.f32 %v3861_v43 }
 0x494   :  { %v3202_v6 = vpop.eup %3201 }
 0x495   :  { %v1422_v13 = vmul.f32 %v3202_v6, %v3200_v3 }
 0x497   :  { %1426 = vst [vmem:[#allocation13 + $0x18] sm:$0xff] %v1422_v13  ;;  %1564 = vmatmul.mubr.f32.vlgmr.msra.gmra.mrb[8].mxu0 %v1422_v13  ;;  %1635 = vmatmul.mubr.f32.vlgmr.msra.gmra.mrb[8].mxu1 %v1422_v13 }
 0x498   :  { %2875 = vmatpush1.bf16.msra.mxu0 %v3720_v33  ;;  %2907 = vmatpush1.bf16.msra.mxu1 %v3723_v53 }
 0x499   :  { %2877 = vmatprep.subr.bf16.mxu0 %v3728_v34  ;;  %2909 = vmatprep.subr.bf16.mxu1 %v3730_v45 }
 0x49a   :  { %1810 = vmatprep.mubr.f32.mxu0 %v3417_v0  ;;  %1881 = vmatprep.mubr.f32.mxu1 %v3417_v0 }
 0x49c   :  { %2879 = vmatpush1.bf16.msra.mxu0 %v3732_v46  ;;  %2911 = vmatpush1.bf16.msra.mxu1 %v3735_v51 }
 0x49d   :  { %2881 = vmatprep.subr.bf16.mxu0 %v3782_v2  ;;  %2913 = vmatprep.subr.bf16.mxu1 %v3784_v11 }
 0x4a0   :  { %2883 = vmatpush1.bf16.msra.mxu0 %v3786_v12  ;;  %2915 = vmatpush1.bf16.msra.mxu1 %v3789_v20 }
 0x4a1   :  { %2885 = vmatprep.subr.bf16.mxu0 %v3794_v47  ;;  %2917 = vmatprep.subr.bf16.mxu1 %v3796_v63 }
 0x4a4   :  { %2887 = vmatpush1.bf16.msra.mxu0 %v3798_v39  ;;  %2919 = vmatpush1.bf16.msra.mxu1 %v3801_v49 }
 0x4a5   :  { %2889 = vmatprep.subr.bf16.mxu0 %v3806_v10  ;;  %2921 = vmatprep.subr.bf16.mxu1 %v3808_v23 }
 0x4a8   :  { %2891 = vmatpush1.bf16.msra.mxu0 %v3810_v26  ;;  %2923 = vmatpush1.bf16.msra.mxu1 %v3813_v36 }
 0x4a9   :  { %2893 = vmatprep.subr.bf16.mxu0 %v3817_v54  ;;  %2925 = vmatprep.subr.bf16.mxu1 %v3820_v9 }
 0x4ac   :  { %2895 = vmatpush1.bf16.msra.mxu0 %v3822_v14  ;;  %2927 = vmatpush1.bf16.msra.mxu1 %v3825_v41 }
 0x4ad   :  { %2897 = vmatprep.subr.bf16.mxu0 %v3828_v1  ;;  %2929 = vmatprep.subr.bf16.mxu1 %v3830_v5 }
 0x4b0   :  { %2899 = vmatpush1.bf16.msra.mxu0 %v3833_v17  ;;  %2931 = vmatpush1.bf16.msra.mxu1 %v3837_v50 }
 0x4b1   :  { %2901 = vmatprep.subr.bf16.mxu0 %v3839_v56  ;;  %2933 = vmatprep.subr.bf16.mxu1 %v3842_v38 }
 0x4b4   :  { %2903 = vmatpush1.bf16.msra.mxu0 %v3845_v16  ;;  %2935 = vmatpush1.bf16.msra.mxu1 %v3849_v19 }
 0x4b5   :  { %2937 = vmatprep.subr.bf16.mxu0 %v3716_v21  ;;  %2969 = vmatprep.subr.bf16.mxu1 %v3718_v31 }
 0x56a   :  { %v1565_v25 = vpop.f32.mrb[8].mxu0  ;;  %v1636_v29 = vpop.f32.mrb[8].mxu1 }
 0x56b   :  { %v3072_v32 = vadd.f32 %v1565_v25, %v3659_v35  ;;  %v1567_v40 = vpop.f32.mrb[9].mxu0  ;;  %v1638_v44 = vpop.f32.mrb[9].mxu1  ;;  %v3088_v22 = vadd.f32 %v1636_v29, %v3668_v59 }
 0x56c   :  { %v3073_v48 = vadd.f32 %v1567_v40, %v3661_v37  ;;  %v3089_v4 = vadd.f32 %v1638_v44, %v3665_v52 }
 0x56d   :  { %v2476_v58 = vmul.f32 -1.442695, %v3072_v32 }
 0x56e   :  { %v2477_v62 = vmul.f32 -1.442695, %v3073_v48  ;;  %v2478_v18 = vmul.f32 -1.442695, %v3089_v4 }
 0x56f   :  { %3203 = vpow2.f32 %v2476_v58 }
 0x570   :  { %3205 = vpow2.f32 %v2477_v62 }
 0x571   :  { %3207 = vpow2.f32 %v2478_v18 }
 0x572   :  { %3209 = vtanh.f32 %v3088_v22 }
 0x579   :  { %v3204_v21 = vpop.eup %3203 }
 0x57a   :  { %v3206_v27 = vpop.eup %3205  ;;  %v1648_v31 = vadd.f32 1.0, %v3204_v21 }
 0x57b   :  { %v1654_v55 = vadd.f32 1.0, %v3206_v27  ;;  %v3208_v57 = vpop.eup %3207 }
 0x57c   :  { %3211 = vrcp.f32 %v1648_v31  ;;  %v3210_v61 = vpop.eup %3209  ;;  %v1661_v24 = vadd.f32 1.0, %v3208_v57 }
 0x57d   :  { %3213 = vrcp.f32 %v1654_v55 }
 0x57e   :  { %3215 = vrcp.f32 %v1661_v24 }
 0x586   :  { %v3212_v7 = vpop.eup %3211 }
 0x587   :  { %v3214_v8 = vpop.eup %3213  ;;  %v1666_v15 = vmul.f32 %v3212_v7, %v3210_v61  ;;  %v2177_v7 = vld [vmem:[#allocation10 + $0x8] sm:$0xff] }
 0x588   :  { %v1665_v28 = vmul.f32 %v3214_v8, %v3861_v43  ;;  %v3216_v60 = vpop.eup %3215  ;;  %v2181_v8 = vld [vmem:[#allocation10 + $0x28] sm:$0xff] }
 0x589   :  { %v3000_v24 = vpack.c.bf16 %v2181_v8, %v2177_v7 }
 0x58a   :  { %v3903_v30 = vadd.f32 %v1666_v15, %v1665_v28  ;;  %v2179_v15 = vld [vmem:[#allocation10 + $0x18] sm:$0xff] }
 0x58b   :  { %v2183_v28 = vld [vmem:[#allocation10 + $0x38] sm:$0xff] }
 0x58c   :  { %3217 = vtanh.f32 %v3903_v30 }
 0x596   :  { %v3218_v42 = vpop.eup %3217 }
 0x597   :  { %v1669_v3 = vmul.f32 %v3218_v42, %v3216_v60  ;;  %v2180_v60 = vld [vmem:[#allocation10 + $0x20] sm:$0xff]  ;;  %v3032_v42 = vpack.c.bf16 %v2183_v28, %v2179_v15 }
 0x599   :  { %1673 = vst [vmem:[#allocation13 + $0x20] sm:$0xff] %v1669_v3  ;;  %1811 = vmatmul.mubr.f32.vlgmr.msra.gmra.mrb[10].mxu0 %v1669_v3  ;;  %1882 = vmatmul.mubr.f32.vlgmr.msra.gmra.mrb[10].mxu1 %v1669_v3 }
 0x59a   :  { %2939 = vmatpush1.bf16.msra.mxu0 %v3720_v33  ;;  %2971 = vmatpush1.bf16.msra.mxu1 %v3723_v53 }
 0x59b   :  { %2941 = vmatprep.subr.bf16.mxu0 %v3728_v34  ;;  %2973 = vmatprep.subr.bf16.mxu1 %v3730_v45 }
 0x59c   :  { %2057 = vmatprep.mubr.f32.mxu0 %v3417_v0  ;;  %2128 = vmatprep.mubr.f32.mxu1 %v3417_v0 }
 0x59e   :  { %2943 = vmatpush1.bf16.msra.mxu0 %v3732_v46  ;;  %2975 = vmatpush1.bf16.msra.mxu1 %v3735_v51 }
 0x59f   :  { %2945 = vmatprep.subr.bf16.mxu0 %v3782_v2  ;;  %2977 = vmatprep.subr.bf16.mxu1 %v3784_v11 }
 0x5a2   :  { %2947 = vmatpush1.bf16.msra.mxu0 %v3786_v12  ;;  %2979 = vmatpush1.bf16.msra.mxu1 %v3789_v20 }
 0x5a3   :  { %2949 = vmatprep.subr.bf16.mxu0 %v3794_v47  ;;  %2981 = vmatprep.subr.bf16.mxu1 %v3796_v63 }
 0x5a6   :  { %2951 = vmatpush1.bf16.msra.mxu0 %v3798_v39  ;;  %2983 = vmatpush1.bf16.msra.mxu1 %v3801_v49 }
 0x5a7   :  { %2953 = vmatprep.subr.bf16.mxu0 %v3806_v10  ;;  %2985 = vmatprep.subr.bf16.mxu1 %v3808_v23 }
 0x5aa   :  { %2955 = vmatpush1.bf16.msra.mxu0 %v3810_v26  ;;  %2987 = vmatpush1.bf16.msra.mxu1 %v3813_v36 }
 0x5ab   :  { %2957 = vmatprep.subr.bf16.mxu0 %v3817_v54  ;;  %2989 = vmatprep.subr.bf16.mxu1 %v3820_v9 }
 0x5ae   :  { %2959 = vmatpush1.bf16.msra.mxu0 %v3822_v14  ;;  %2991 = vmatpush1.bf16.msra.mxu1 %v3825_v41 }
 0x5af   :  { %2961 = vmatprep.subr.bf16.mxu0 %v3828_v1  ;;  %2993 = vmatprep.subr.bf16.mxu1 %v3830_v5 }
 0x5b2   :  { %2963 = vmatpush1.bf16.msra.mxu0 %v3833_v17  ;;  %2995 = vmatpush1.bf16.msra.mxu1 %v3837_v50 }
 0x5b3   :  { %2965 = vmatprep.subr.bf16.mxu0 %v3839_v56  ;;  %2997 = vmatprep.subr.bf16.mxu1 %v3842_v38 }
 0x5b6   :  { %2967 = vmatpush1.bf16.msra.mxu0 %v3845_v16  ;;  %2999 = vmatpush1.bf16.msra.mxu1 %v3849_v19 }
 0x5b7   :  { %3001 = vmatprep.subr.bf16.mxu0 %v3000_v24  ;;  %3033 = vmatprep.subr.bf16.mxu1 %v3032_v42 }
 0x66c   :  { %v1812_v33 = vpop.f32.mrb[10].mxu0  ;;  %v1883_v53 = vpop.f32.mrb[10].mxu1 }
 0x66d   :  { %v3074_v34 = vadd.f32 %v1812_v33, %v3659_v35  ;;  %v1814_v45 = vpop.f32.mrb[11].mxu0  ;;  %v1885_v46 = vpop.f32.mrb[11].mxu1  ;;  %v3090_v29 = vadd.f32 %v1883_v53, %v3668_v59  ;;  %v2178_v33 = vld [vmem:[#allocation10 + $0x10] sm:$0xff] }
 0x66e   :  { %v3075_v51 = vadd.f32 %v1814_v45, %v3661_v37  ;;  %v3091_v13 = vadd.f32 %v1885_v46, %v3665_v52  ;;  %v2182_v53 = vld [vmem:[#allocation10 + $0x30] sm:$0xff]  ;;  %v2185_v45 = vld [vmem:[#allocation10 + $0x48] sm:$0xff] }
 0x66f   :  { %v2479_v43 = vmul.f32 -1.442695, %v3074_v34  ;;  %v3034_v34 = vpack.c.bf16 %v2182_v53, %v2178_v33  ;;  %v2189_v46 = vld [vmem:[#allocation10 + $0x68] sm:$0xff] }
 0x670   :  { %v2480_v6 = vmul.f32 -1.442695, %v3075_v51  ;;  %v2481_v25 = vmul.f32 -1.442695, %v3091_v13  ;;  %v2187_v51 = vld [vmem:[#allocation10 + $0x58] sm:$0xff]  ;;  %v2188_v13 = vld [vmem:[#allocation10 + $0x60] sm:$0xff] }
 0x671   :  { %3219 = vpow2.f32 %v2479_v43  ;;  %v2191_v43 = vld [vmem:[#allocation10 + $0x78] sm:$0xff] }
 0x672   :  { %3221 = vpow2.f32 %v2480_v6  ;;  %v2184_v6 = vld [vmem:[#allocation10 + $0x40] sm:$0xff] }
 0x673   :  { %3223 = vpow2.f32 %v2481_v25  ;;  %v3036_v25 = vpack.c.bf16 %v2191_v43, %v2187_v51 }
 0x674   :  { %3225 = vtanh.f32 %v3090_v29  ;;  %v3006_v29 = vpack.c.bf16 %v2188_v13, %v2184_v6 }
 0x67b   :  { %v3220_v32 = vpop.eup %3219 }
 0x67c   :  { %v3222_v40 = vpop.eup %3221  ;;  %v1895_v44 = vadd.f32 1.0, %v3220_v32  ;;  %v2186_v32 = vld [vmem:[#allocation10 + $0x50] sm:$0xff] }
 0x67d   :  { %v1901_v48 = vadd.f32 1.0, %v3222_v40  ;;  %v3224_v58 = vpop.eup %3223  ;;  %v2190_v40 = vld [vmem:[#allocation10 + $0x70] sm:$0xff] }
 0x67e   :  { %3227 = vrcp.f32 %v1895_v44  ;;  %v3226_v62 = vpop.eup %3225  ;;  %v1908_v21 = vadd.f32 1.0, %v3224_v58  ;;  %v3038_v44 = vpack.c.bf16 %v2190_v40, %v2186_v32 }
 0x67f   :  { %3229 = vrcp.f32 %v1901_v48 }
 0x680   :  { %3231 = vrcp.f32 %v1908_v21 }
 0x688   :  { %v3228_v4 = vpop.eup %3227 }
 0x689   :  { %v3230_v18 = vpop.eup %3229  ;;  %v1913_v22 = vmul.f32 %v3228_v4, %v3226_v62 }
 0x68a   :  { %v1912_v27 = vmul.f32 %v3230_v18, %v3903_v30  ;;  %v3232_v55 = vpop.eup %3231  ;;  %v2176_v30 = vld [vmem:[#allocation10] sm:$0xff] }
 0x68b   :  { %v3002_v3 = vpack.c.bf16 %v2180_v60, %v2176_v30 }
 0x68c   :  { %v3943_v31 = vadd.f32 %v1913_v22, %v1912_v27 }
 0x68e   :  { %3233 = vtanh.f32 %v3943_v31 }
 0x698   :  { %v3234_v57 = vpop.eup %3233 }
 0x699   :  { %v1916_v61 = vmul.f32 %v3234_v57, %v3232_v55 }
 0x69b   :  { %1920 = vst [vmem:[#allocation13 + $0x28] sm:$0xff] %v1916_v61  ;;  %2058 = vmatmul.mubr.f32.vlgmr.msra.gmra.mrb[12].mxu0 %v1916_v61  ;;  %2129 = vmatmul.mubr.f32.vlgmr.msra.gmra.mrb[12].mxu1 %v1916_v61 }
 0x69c   :  { %2304 = vmatprep.mubr.f32.mxu0 %v3417_v0  ;;  %2375 = vmatprep.mubr.f32.mxu1 %v3417_v0  ;;  %v3004_v0 = vpack.c.bf16 %v2189_v46, %v2185_v45 }
 0x69d   :  { %3003 = vmatpush1.bf16.msra.mxu0 %v3002_v3  ;;  %3035 = vmatpush1.bf16.msra.mxu1 %v3034_v34 }
 0x69e   :  { %3005 = vmatprep.subr.bf16.mxu0 %v3004_v0  ;;  %3037 = vmatprep.subr.bf16.mxu1 %v3036_v25 }
 0x6a1   :  { %3007 = vmatpush1.bf16.msra.mxu0 %v3006_v29  ;;  %3039 = vmatpush1.bf16.msra.mxu1 %v3038_v44 }
 0x6a2   :  { %3009 = vmatprep.subr.bf16.mxu0 %v3782_v2  ;;  %3041 = vmatprep.subr.bf16.mxu1 %v3784_v11 }
 0x6a5   :  { %3011 = vmatpush1.bf16.msra.mxu0 %v3786_v12  ;;  %3043 = vmatpush1.bf16.msra.mxu1 %v3789_v20 }
 0x6a6   :  { %3013 = vmatprep.subr.bf16.mxu0 %v3794_v47  ;;  %3045 = vmatprep.subr.bf16.mxu1 %v3796_v63 }
 0x6a9   :  { %3015 = vmatpush1.bf16.msra.mxu0 %v3798_v39  ;;  %3047 = vmatpush1.bf16.msra.mxu1 %v3801_v49 }
 0x6aa   :  { %3017 = vmatprep.subr.bf16.mxu0 %v3806_v10  ;;  %3049 = vmatprep.subr.bf16.mxu1 %v3808_v23 }
 0x6ad   :  { %3019 = vmatpush1.bf16.msra.mxu0 %v3810_v26  ;;  %3051 = vmatpush1.bf16.msra.mxu1 %v3813_v36 }
 0x6ae   :  { %3021 = vmatprep.subr.bf16.mxu0 %v3817_v54  ;;  %3053 = vmatprep.subr.bf16.mxu1 %v3820_v9 }
 0x6b1   :  { %3023 = vmatpush1.bf16.msra.mxu0 %v3822_v14  ;;  %3055 = vmatpush1.bf16.msra.mxu1 %v3825_v41 }
 0x6b2   :  { %3025 = vmatprep.subr.bf16.mxu0 %v3828_v1  ;;  %3057 = vmatprep.subr.bf16.mxu1 %v3830_v5 }
 0x6b5   :  { %3027 = vmatpush1.bf16.msra.mxu0 %v3833_v17  ;;  %3059 = vmatpush1.bf16.msra.mxu1 %v3837_v50 }
 0x6b6   :  { %3029 = vmatprep.subr.bf16.mxu0 %v3839_v56  ;;  %3061 = vmatprep.subr.bf16.mxu1 %v3842_v38 }
 0x6b9   :  { %3031 = vmatpush1.bf16.msra.mxu0 %v3845_v16  ;;  %3063 = vmatpush1.bf16.msra.mxu1 %v3849_v19 }
 0x76e   :  { %v2059_v2 = vpop.f32.mrb[12].mxu0  ;;  %v2130_v11 = vpop.f32.mrb[12].mxu1 }
 0x76f   :  { %v3076_v12 = vadd.f32 %v2059_v2, %v3659_v35  ;;  %v2061_v20 = vpop.f32.mrb[13].mxu0  ;;  %v2132_v47 = vpop.f32.mrb[13].mxu1  ;;  %v3092_v26 = vadd.f32 %v2130_v11, %v3668_v59 }
 0x770   :  { %v3077_v63 = vadd.f32 %v2061_v20, %v3661_v37  ;;  %v3093_v10 = vadd.f32 %v2132_v47, %v3665_v52 }
 0x771   :  { %v2482_v39 = vmul.f32 -1.442695, %v3076_v12 }
 0x772   :  { %v2483_v49 = vmul.f32 -1.442695, %v3077_v63  ;;  %v2484_v23 = vmul.f32 -1.442695, %v3093_v10 }
 0x773   :  { %3235 = vpow2.f32 %v2482_v39 }
 0x774   :  { %3237 = vpow2.f32 %v2483_v49 }
 0x775   :  { %3239 = vpow2.f32 %v2484_v23 }
 0x776   :  { %3241 = vtanh.f32 %v3092_v26 }
 0x77d   :  { %v3236_v36 = vpop.eup %3235 }
 0x77e   :  { %v3238_v54 = vpop.eup %3237  ;;  %v2142_v9 = vadd.f32 1.0, %v3236_v36 }
 0x77f   :  { %v2148_v14 = vadd.f32 1.0, %v3238_v54  ;;  %v3240_v41 = vpop.eup %3239 }
 0x780   :  { %3243 = vrcp.f32 %v2142_v9  ;;  %v3242_v1 = vpop.eup %3241  ;;  %v2155_v56 = vadd.f32 1.0, %v3240_v41 }
 0x781   :  { %3245 = vrcp.f32 %v2148_v14 }
 0x782   :  { %3247 = vrcp.f32 %v2155_v56 }
 0x78a   :  { %v3244_v5 = vpop.eup %3243 }
 0x78b   :  { %v3246_v17 = vpop.eup %3245  ;;  %v2160_v50 = vmul.f32 %v3244_v5, %v3242_v1 }
 0x78c   :  { %v2159_v38 = vmul.f32 %v3246_v17, %v3943_v31  ;;  %v3248_v19 = vpop.eup %3247 }
 0x78e   :  { %v2161_v16 = vadd.f32 %v2160_v50, %v2159_v38 }
 0x790   :  { %3249 = vtanh.f32 %v2161_v16 }
 0x79a   :  { %v3250_v48 = vpop.eup %3249 }
 0x79b   :  { %v2163_v58 = vmul.f32 %v3250_v48, %v3248_v19 }
 0x79d   :  { %2167 = vst [vmem:[#allocation13 + $0x30] sm:$0xff] %v2163_v58  ;;  %2305 = vmatmul.mubr.f32.vlgmr.msra.gmra.mrb[14].mxu0 %v2163_v58  ;;  %2376 = vmatmul.mubr.f32.vlgmr.msra.gmra.mrb[14].mxu1 %v2163_v58 }
 0x870   :  { %v2306_v62 = vpop.f32.mrb[14].mxu0  ;;  %v2377_v4 = vpop.f32.mrb[14].mxu1 }
 0x871   :  { %v3078_v18 = vadd.f32 %v2306_v62, %v3659_v35  ;;  %v2308_v22 = vpop.f32.mrb[15].mxu0  ;;  %v2379_v21 = vpop.f32.mrb[15].mxu1  ;;  %v3094_v7 = vadd.f32 %v2377_v4, %v3668_v59 }
 0x872   :  { %v3079_v27 = vadd.f32 %v2308_v22, %v3661_v37  ;;  %v3095_v31 = vadd.f32 %v2379_v21, %v3665_v52 }
 0x873   :  { %v2485_v55 = vmul.f32 -1.442695, %v3078_v18 }
 0x874   :  { %v2486_v57 = vmul.f32 -1.442695, %v3079_v27  ;;  %v2487_v61 = vmul.f32 -1.442695, %v3095_v31 }
 0x875   :  { %3251 = vpow2.f32 %v2485_v55 }
 0x876   :  { %3253 = vpow2.f32 %v2486_v57 }
 0x877   :  { %3255 = vpow2.f32 %v2487_v61 }
 0x878   :  { %3257 = vtanh.f32 %v3094_v7 }
 0x87f   :  { %v3252_v8 = vpop.eup %3251 }
 0x880   :  { %v3254_v15 = vpop.eup %3253  ;;  %v2389_v24 = vadd.f32 1.0, %v3252_v8 }
 0x881   :  { %v2395_v28 = vadd.f32 1.0, %v3254_v15  ;;  %v3256_v35 = vpop.eup %3255 }
 0x882   :  { %3259 = vrcp.f32 %v2389_v24  ;;  %v3258_v30 = vpop.eup %3257  ;;  %v2402_v3 = vadd.f32 1.0, %v3256_v35 }
 0x883   :  { %3261 = vrcp.f32 %v2395_v28 }
 0x884   :  { %3263 = vrcp.f32 %v2402_v3 }
 0x88c   :  { %v3260_v37 = vpop.eup %3259 }
 0x88d   :  { %v3262_v60 = vpop.eup %3261  ;;  %v2407_v42 = vmul.f32 %v3260_v37, %v3258_v30 }
 0x88e   :  { %v2406_v52 = vmul.f32 %v3262_v60, %v2161_v16 }
 0x890   :  { %v2408_v33 = vadd.f32 %v2407_v42, %v2406_v52 }
 0x892   :  { %3265 = vtanh.f32 %v2408_v33  ;;  %2419 = vst [vmem:[#allocation14] sm:$0xff] %v2408_v33 }
 0x893   :  { %3366 = shalt.err (!%p3363_p8)
}
 0x894   :  { %s3367_s22 = scalar_lea.hbm %s4013_s5, 128 }
 0x895   :  { %p3368_p9 = scmp.ne.s32.totalorder %s4013_s5, %s3367_s22  ;;  %p3371_p10 = scmp.lt.u32.totalorder %s3367_s22, %s4013_s5 }
 0x897   :  { %p3373_p11 = pnand %p3371_p10, %p3368_p9 }
 0x899   :  { %3376 = shalt.err (!%p3373_p11)
}
 0x89a   :  { %2445 = dma.vmem_to_hbm [thread:$0]  %s2443_s29, 128, %s4013_s5, [#allocation15]   ;;  %v3264_v59 = vpop.eup %3263 }
 0x89b   :  { %s3419_s6 = smov [#allocation13]  }
 0x89c   :  { %s2429_s7 = sshll.u32 %s3419_s6, 4  ;;  %v3266_v53 = vpop.eup %3265  ;;  %s2430_s7 = int_to_ptr.vmem [resolvable:$true] %s2429_s7 }
 0x89d   :  { %v2410_v34 = vmul.f32 %v3266_v53, %v3264_v59  ;;  %s3377_s0 = scalar_lea.vmem %s2430_s7, 1024  ;;  %p3382_p13 = scmp.lt.s32.totalorder %s2430_s7, %s2430_s7 }
 0x89e   :  { %p3378_p12 = scmp.ne.s32.totalorder %s2430_s7, %s3377_s0  ;;  %p3383_p0 = scmp.lt.s32.totalorder %s3377_s0, %s3377_s0 }
 0x89f   :  { %2414 = vst [vmem:[#allocation13 + $0x38] sm:$0xff] %v2410_v34 }
 0x8a0   :  { %p3384_p1 = por %p3383_p0, %p3382_p13 }
 0x8a2   :  { %p3385_p2 = pnand %p3384_p1, %p3378_p12 }
 0x8a4   :  { %3388 = shalt.err (!%p3385_p2)
}
 0x8a5   :  { %s3389_s10 = scalar_lea.hbm %s4012_s4, 1024 }
 0x8a6   :  { %p3390_p3 = scmp.ne.s32.totalorder %s4012_s4, %s3389_s10  ;;  %p3393_p4 = scmp.lt.u32.totalorder %s3389_s10, %s4012_s4 }
 0x8a8   :  { %p3395_p5 = pnand %p3393_p4, %p3390_p3 }
 0x8aa   :  { %3398 = shalt.err (!%p3395_p5)
}
 0x8ab   :  { %2435 = dma.vmem_to_hbm [thread:$0]  %s2430_s7, 1024, %s4012_s4, [#allocation7], %s3413_s1, %s3413_s1, %s3414_s17  }
 0x8ac   :  { %3405 = dma.done.wait [#allocation7], 1024  }
 0x8ad   :  { %3406 = vsyncadd [#allocation7], 4294966272 }
 0x8ae   :  { %3407 = dma.done.wait [#allocation15], 128  }
 0x8af   :  { %3408 = vsyncadd [#allocation15], 4294967168 }
 0x8b0   :  { %2452 = vsyncpa [#allocation6], 1 }
 0x8b1   :  { %2453 = vsyncpa [#allocation9], 1 }
 0x8b2   :  { %2454 = vsyncpa [#allocation12], 1 }
 0x8b3   :  { %2455 = vsyncpa [#allocation7], 1 }
 0x8b4   :  { %2456 = vsyncpa [#allocation15], 1 }

</bundles_post_ra>
